<compile_context>
chip_gen: v7x
topology: tpu7x:2x2x1
jax: 0.10.0
libtpu: 0.0.40
codegen_flags: <defaults>
</compile_context>

<pallas_src>
import jax
import jax.numpy as jnp
from jax import lax
from jax.experimental import pallas as pl
from jax.experimental.pallas import tpu as pltpu


# -----------------------------------------------------------------------------
# Pallas kernel: LayerNorm -> interleaved 2-layer LSTM -> mask -> fc -> decoder
# All tensors arrive flattened time-major: row r = t * Bp + b.
# -----------------------------------------------------------------------------
def _blitz_kernel(feats_ref, sl_ref, ln_g_ref, ln_b_ref,
                  w_ih0_ref, b0_ref, w_hh0_ref,
                  w_ih1_ref, b1_ref, w_hh1_ref,
                  w_fc_ref, b_fc_ref, w_dec_ref, b_dec_ref,
                  out_ref):
    TBp, _F = feats_ref.shape
    Bp = sl_ref.shape[0]
    T = TBp // Bp
    H = w_hh0_ref.shape[0]

    f32 = jnp.float32
    bf16 = jnp.bfloat16

    # ---- LayerNorm over the feature axis (eps matches nn.LayerNorm) ----
    x = feats_ref[...]                                       # (T*Bp, F) f32
    mean = jnp.mean(x, axis=-1, keepdims=True)
    var = jnp.mean((x - mean) ** 2, axis=-1, keepdims=True)
    xn = (x - mean) * lax.rsqrt(var + 1e-5)
    xn = xn * ln_g_ref[...] + ln_b_ref[...]

    # ---- Hoisted layer-0 input projections for ALL steps (off the serial
    #      path): one (T*Bp, 4H) bf16 MXU matmul, f32 accumulation. ----
    gi0 = jnp.dot(xn.astype(bf16), w_ih0_ref[...],
                  preferred_element_type=f32) + b0_ref[...]  # (T*Bp, 4H) f32

    # Fused per-gate weights (gate order i, f, g, o along the 4H axis).
    w_hh0 = w_hh0_ref[...]                                   # (H, 4H) bf16
    w_ih1 = w_ih1_ref[...]                                   # (H, 4H) bf16
    w_hh1 = w_hh1_ref[...]                                   # (H, 4H) bf16
    b1 = b1_ref[...]                                         # (1, 4H) f32
    sl = sl_ref[...]                                         # (Bp, 1) f32

    def gates(g):
        i = jax.nn.sigmoid(g[:, 0 * H:1 * H])
        f = jax.nn.sigmoid(g[:, 1 * H:2 * H])
        gg = jnp.tanh(g[:, 2 * H:3 * H])
        o = jax.nn.sigmoid(g[:, 3 * H:4 * H])
        return i, f, gg, o

    def layer1_step(t, x1, h1, c1):
        # x1 = layer-0 output at step t. Length mask folded into the output.
        g1 = (jnp.dot(x1.astype(bf16), w_ih1, preferred_element_type=f32) + b1
              + jnp.dot(h1.astype(bf16), w_hh1, preferred_element_type=f32))
        i, f, gg, o = gates(g1)
        c1 = f * c1 + i * gg
        h1 = o * jnp.tanh(c1)
        mask_t = (sl > t).astype(f32)                        # (Bp, 1), t is static
        return h1, c1, h1 * mask_t

    zeros = jnp.zeros((Bp, H), f32)
    h0, c0 = zeros, zeros
    h1, c1 = zeros, zeros
    h1_rows = []

    # ---- Skew-interleaved 2-layer recurrence (fully unrolled; T is small &
    #      static). At iteration t: layer-0 step t uses h0_{t-1}; layer-1 step
    #      t-1 uses the SAME (not yet updated) h0_{t-1} as its input, so the
    #      two matmul/EUP chains are independent and overlap. ----
    for t in range(T):
        g0 = gi0[t * Bp:(t + 1) * Bp, :] + jnp.dot(
            h0.astype(bf16), w_hh0, preferred_element_type=f32)
        if t >= 1:
            h1, c1, row = layer1_step(t - 1, h0, h1, c1)
            h1_rows.append(row)
        i0, f0, gg0, o0 = gates(g0)
        c0 = f0 * c0 + i0 * gg0
        h0 = o0 * jnp.tanh(c0)
    # Drain: layer-1 step T-1 on the final layer-0 output.
    h1, c1, row = layer1_step(T - 1, h0, h1, c1)
    h1_rows.append(row)

    # Masked layer-1 outputs for all steps == pad_packed_sequence output.
    h_all = jnp.concatenate(h1_rows, axis=0)                 # (T*Bp, H) f32

    # ---- fc -> ReLU -> (Dropout = identity in eval) -> decoder -> sigmoid ----
    # TODO(synk): inter-layer LSTM dropout and decoder Dropout apply only in
    # training; eval semantics (identity) are implemented here.
    fc = jnp.dot(h_all.astype(bf16), w_fc_ref[...],
                 preferred_element_type=f32) + b_fc_ref[...]
    dec = jnp.dot(jnp.maximum(fc, 0.0).astype(bf16), w_dec_ref[...],
                  preferred_element_type=f32) + b_dec_ref[...]
    out_ref[...] = jax.nn.sigmoid(dec)                       # (T*Bp, O)


# -----------------------------------------------------------------------------
# Wrapper: embedding lookup + concat + batch padding + time-major flatten
# (XLA glue), then a single pallas_call.
# -----------------------------------------------------------------------------
def blitz_lstm_forward(x, seq_lens, params):
    """x: (B, T, input_dim) f32, last column = position ids; seq_lens: (B,)."""
    B, T, _ = x.shape
    H = params["w_hh0"].shape[0]
    H2 = params["w_fc"].shape[-1]
    O = params["w_dec"].shape[-1]

    pos_ids = x[:, :, -1].astype(jnp.int32)                  # (B, T)
    pos_emb = params["emb"][pos_ids]                         # (B, T, pe)
    feats = jnp.concatenate([x[:, :, :-1], pos_emb], axis=2).astype(jnp.float32)
    F = feats.shape[-1]

    # Pad the batch to a sublane multiple (>= 8) so every (Bp, .) operand in
    # the kernel is sublane-dense. Padded rows get seq_len = 0 (fully masked)
    # and are sliced away below.
    Bp = max(8, ((B + 7) // 8) * 8)
    pad = Bp - B
    if pad:
        feats = jnp.pad(feats, ((0, pad), (0, 0), (0, 0)))
    sl = seq_lens.astype(jnp.float32)
    if pad:
        sl = jnp.pad(sl, (0, pad))
    sl = sl.reshape(Bp, 1)

    # Time-major flatten once on the XLA side: row r = t*Bp + b. No reshape is
    # ever traced inside the kernel.
    feats_tm = jnp.transpose(feats, (1, 0, 2)).reshape(T * Bp, F)

    weight_keys = ("ln_g", "ln_b", "w_ih0", "b0", "w_hh0",
                   "w_ih1", "b1", "w_hh1", "w_fc", "b_fc", "w_dec", "b_dec")

    def _full_spec(a):
        nd = a.ndim
        return pl.BlockSpec(a.shape, lambda i, _nd=nd: (0,) * _nd)

    in_specs = [_full_spec(feats_tm), _full_spec(sl)]
    in_specs += [_full_spec(params[k]) for k in weight_keys]
    out_spec = pl.BlockSpec((T * Bp, O), lambda i: (0, 0))

    # Advisory cost estimate for the XLA scheduler around the custom call.
    H4 = 4 * H
    flops = 2 * T * Bp * F * H4                  # hoisted layer-0 input projection
    flops += 3 * 2 * T * Bp * H * H4             # l0 recurrent + l1 input + l1 recurrent
    flops += 2 * T * Bp * (H * H2 + H2 * O)      # fc + decoder
    flops += T * Bp * (8 * F + 40 * H)           # layernorm + gate elementwise (rough)
    transcendentals = 2 * T * Bp * 5 * H + T * Bp * O

    in_bytes = (feats_tm.size * 4 + sl.size * 4
                + sum(int(params[k].size) * params[k].dtype.itemsize
                      for k in weight_keys))
    out_bytes = T * Bp * O * 4
    bytes_accessed = in_bytes + out_bytes
    # VMEM budget from actual buffer sizes (double-buffered blocks + headroom);
    # stays well inside v7x's 64 MiB as well as v5e/v6e's 128 MiB.
    vmem_limit = int(min(64 << 20, 2 * (in_bytes + out_bytes) + (4 << 20)))

    out = pl.pallas_call(
        _blitz_kernel,
        out_shape=jax.ShapeDtypeStruct((T * Bp, O), jnp.float32),
        grid=(1,),
        in_specs=in_specs,
        out_specs=out_spec,
        compiler_params=pltpu.CompilerParams(
            dimension_semantics=("arbitrary",),
            vmem_limit_bytes=vmem_limit),
        cost_estimate=pl.CostEstimate(flops=int(flops),
                                      transcendentals=int(transcendentals),
                                      bytes_accessed=int(bytes_accessed)),
    )(feats_tm, sl, *[params[k] for k in weight_keys])

    out = out.reshape(T, Bp, O)[:, :B, :]                    # drop batch padding
    out = jnp.transpose(out, (1, 0, 2))                      # back to (B, T, O)
    return jnp.squeeze(out)                                  # matches torch .squeeze()


# -----------------------------------------------------------------------------
# Deterministic parameter init (shapes follow BlitzLSTM.__init__, stored in the
# kernel-friendly pre-transposed / gate-fused layout):
#   w_ih*: (in_dim, 4H) bf16 == torch weight_ih_l*.T   (gate order i, f, g, o)
#   w_hh*: (H, 4H)      bf16 == torch weight_hh_l*.T
#   b*:    (1, 4H)      f32  == bias_ih_l* + bias_hh_l*
#   w_fc:  (H, H/2) bf16 = fc.weight.T ; w_dec: (H/2, O) bf16 = decoder[2].weight.T
# -----------------------------------------------------------------------------
def init_params(key, input_dim, hidden_dim, output_dim,
                n_positions=5, position_embedding_dim=4):
    F = input_dim + position_embedding_dim - 1
    H = hidden_dim
    H2 = hidden_dim // 2
    ks = jax.random.split(key, 12)

    def nf(k, shape, s=0.1):
        return (s * jax.random.normal(k, shape)).astype(jnp.float32)

    def nb(k, shape, s=0.1):
        return (s * jax.random.normal(k, shape)).astype(jnp.bfloat16)

    return {
        "emb":   nf(ks[0], (n_positions, position_embedding_dim)),
        "ln_g":  jnp.ones((1, F), jnp.float32),
        "ln_b":  jnp.zeros((1, F), jnp.float32),
        "w_ih0": nb(ks[1], (F, 4 * H)),
        "w_hh0": nb(ks[2], (H, 4 * H)),
        "b0":    nf(ks[3], (1, 4 * H)) + nf(ks[4], (1, 4 * H)),
        "w_ih1": nb(ks[5], (H, 4 * H)),
        "w_hh1": nb(ks[6], (H, 4 * H)),
        "b1":    nf(ks[7], (1, 4 * H)) + nf(ks[8], (1, 4 * H)),
        "w_fc":  nb(ks[9], (H, H2)),
        "b_fc":  nf(ks[10], (1, H2)),
        "w_dec": nb(ks[11], (H2, output_dim)),
        "b_dec": jnp.zeros((1, output_dim), jnp.float32),
    }


if __name__ == "__main__":
    B, T = 2, 8
    input_dim = 13          # includes the trailing position-id column -> F = 16
    hidden_dim = 32
    output_dim = 1
    # num_lstm_layers = 2 : the kernel implements exactly 2 stacked LSTM layers.

    key = jax.random.PRNGKey(0)
    k_feat, k_pos, k_param = jax.random.split(key, 3)

    real_feats = jax.random.normal(k_feat, (B, T, input_dim - 1), jnp.float32)
    pos_col = jax.random.randint(k_pos, (B, T, 1), 0, 5).astype(jnp.float32)
    x = jnp.concatenate([real_feats, pos_col], axis=2)        # (B, T, input_dim)

    seq_lens = jnp.array([T, 5], dtype=jnp.int32)             # padded batch, max == T

    params = init_params(k_param, input_dim, hidden_dim, output_dim)

    out = jax.block_until_ready(blitz_lstm_forward(x, seq_lens, params))
    assert out.shape == (B, T), out.shape
    assert bool(jnp.all(jnp.isfinite(out)))
    print("KERNEL_OK")
</pallas_src>

<mosaic_0001>
module attributes {stable_mosaic.version = 11 : i64} {
  func.func @_blitz_kernel(%arg0: i32, %arg1: memref<64x16xf32, #tpu.memory_space<vmem>>, %arg2: memref<8x1xf32, #tpu.memory_space<vmem>>, %arg3: memref<1x16xf32, #tpu.memory_space<vmem>>, %arg4: memref<1x16xf32, #tpu.memory_space<vmem>>, %arg5: memref<16x128xbf16, #tpu.memory_space<vmem>>, %arg6: memref<1x128xf32, #tpu.memory_space<vmem>>, %arg7: memref<32x128xbf16, #tpu.memory_space<vmem>>, %arg8: memref<32x128xbf16, #tpu.memory_space<vmem>>, %arg9: memref<1x128xf32, #tpu.memory_space<vmem>>, %arg10: memref<32x128xbf16, #tpu.memory_space<vmem>>, %arg11: memref<32x16xbf16, #tpu.memory_space<vmem>>, %arg12: memref<1x16xf32, #tpu.memory_space<vmem>>, %arg13: memref<16x1xbf16, #tpu.memory_space<vmem>>, %arg14: memref<1x1xf32, #tpu.memory_space<vmem>>, %arg15: memref<64x1xf32, #tpu.memory_space<vmem>>) attributes {dimension_semantics = [#tpu.dimension_semantics<arbitrary>], iteration_bounds = array<i64: 1>, scalar_prefetch = 0 : i64, scratch_operands = 0 : i64, tpu.core_type = #tpu.core_type<tc>, window_params = [{pipeline_mode = #tpu.pipeline_mode<synchronous>, transform_indices = @transform_0, window_bounds = array<i64: 64, 16>}, {pipeline_mode = #tpu.pipeline_mode<synchronous>, transform_indices = @transform_1, window_bounds = array<i64: 8, 1>}, {pipeline_mode = #tpu.pipeline_mode<synchronous>, transform_indices = @transform_2, window_bounds = array<i64: 1, 16>}, {pipeline_mode = #tpu.pipeline_mode<synchronous>, transform_indices = @transform_3, window_bounds = array<i64: 1, 16>}, {pipeline_mode = #tpu.pipeline_mode<synchronous>, transform_indices = @transform_4, window_bounds = array<i64: 16, 128>}, {pipeline_mode = #tpu.pipeline_mode<synchronous>, transform_indices = @transform_5, window_bounds = array<i64: 1, 128>}, {pipeline_mode = #tpu.pipeline_mode<synchronous>, transform_indices = @transform_6, window_bounds = array<i64: 32, 128>}, {pipeline_mode = #tpu.pipeline_mode<synchronous>, transform_indices = @transform_7, window_bounds = array<i64: 32, 128>}, {pipeline_mode = #tpu.pipeline_mode<synchronous>, transform_indices = @transform_8, window_bounds = array<i64: 1, 128>}, {pipeline_mode = #tpu.pipeline_mode<synchronous>, transform_indices = @transform_9, window_bounds = array<i64: 32, 128>}, {pipeline_mode = #tpu.pipeline_mode<synchronous>, transform_indices = @transform_10, window_bounds = array<i64: 32, 16>}, {pipeline_mode = #tpu.pipeline_mode<synchronous>, transform_indices = @transform_11, window_bounds = array<i64: 1, 16>}, {pipeline_mode = #tpu.pipeline_mode<synchronous>, transform_indices = @transform_12, window_bounds = array<i64: 16, 1>}, {pipeline_mode = #tpu.pipeline_mode<synchronous>, transform_indices = @transform_13, window_bounds = array<i64: 1, 1>}, {pipeline_mode = #tpu.pipeline_mode<synchronous>, transform_indices = @transform_14, window_bounds = array<i64: 64, 1>}]} {
    %c0 = arith.constant 0 : index
    %c0_0 = arith.constant 0 : index
    %0 = vector.load %arg1[%c0, %c0_0] : memref<64x16xf32, #tpu.memory_space<vmem>>, vector<64x16xf32>
    %cst = arith.constant dense<0.000000e+00> : vector<64xf32>
    %1 = vector.multi_reduction <add>, %0, %cst [1] : vector<64x16xf32> to vector<64xf32>
    %2 = vector.shape_cast %1 : vector<64xf32> to vector<64x1xf32>
    %cst_1 = arith.constant 1.600000e+01 : f32
    %3 = vector.broadcast %cst_1 : f32 to vector<64x1xf32>
    %4 = arith.divf %2, %3 : vector<64x1xf32>
    %5 = vector.broadcast %4 : vector<64x1xf32> to vector<64x16xf32>
    %6 = arith.subf %0, %5 : vector<64x16xf32>
    %7 = arith.mulf %6, %6 : vector<64x16xf32>
    %cst_2 = arith.constant dense<0.000000e+00> : vector<64xf32>
    %8 = vector.multi_reduction <add>, %7, %cst_2 [1] : vector<64x16xf32> to vector<64xf32>
    %9 = vector.shape_cast %8 : vector<64xf32> to vector<64x1xf32>
    %cst_3 = arith.constant 1.600000e+01 : f32
    %10 = vector.broadcast %cst_3 : f32 to vector<64x1xf32>
    %11 = arith.divf %9, %10 : vector<64x1xf32>
    %12 = vector.broadcast %4 : vector<64x1xf32> to vector<64x16xf32>
    %13 = arith.subf %0, %12 : vector<64x16xf32>
    %cst_4 = arith.constant 9.99999974E-6 : f32
    %14 = vector.broadcast %cst_4 : f32 to vector<64x1xf32>
    %15 = arith.addf %11, %14 : vector<64x1xf32>
    %16 = math.rsqrt %15 : vector<64x1xf32>
    %17 = vector.broadcast %16 : vector<64x1xf32> to vector<64x16xf32>
    %18 = arith.mulf %13, %17 : vector<64x16xf32>
    %c0_5 = arith.constant 0 : index
    %c0_6 = arith.constant 0 : index
    %19 = vector.load %arg3[%c0_5, %c0_6] : memref<1x16xf32, #tpu.memory_space<vmem>>, vector<1x16xf32>
    %20 = vector.broadcast %19 : vector<1x16xf32> to vector<64x16xf32>
    %21 = arith.mulf %18, %20 : vector<64x16xf32>
    %c0_7 = arith.constant 0 : index
    %c0_8 = arith.constant 0 : index
    %22 = vector.load %arg4[%c0_7, %c0_8] : memref<1x16xf32, #tpu.memory_space<vmem>>, vector<1x16xf32>
    %23 = vector.broadcast %22 : vector<1x16xf32> to vector<64x16xf32>
    %24 = arith.addf %21, %23 : vector<64x16xf32>
    %25 = arith.truncf %24 : vector<64x16xf32> to vector<64x16xbf16>
    %c0_9 = arith.constant 0 : index
    %c0_10 = arith.constant 0 : index
    %26 = vector.load %arg5[%c0_9, %c0_10] : memref<16x128xbf16, #tpu.memory_space<vmem>>, vector<16x128xbf16>
    %cst_11 = arith.constant dense<0.000000e+00> : vector<64x128xf32>
    %27 = tpu.matmul %25, %26, %cst_11 {dimension_numbers = #tpu.dot_dimension_numbers<[1], [0], [0], [1], [0, 0, 1, 1], [], []>} : vector<64x16xbf16>, vector<16x128xbf16>, vector<64x128xf32> -> vector<64x128xf32>
    %c0_12 = arith.constant 0 : index
    %c0_13 = arith.constant 0 : index
    %28 = vector.load %arg6[%c0_12, %c0_13] : memref<1x128xf32, #tpu.memory_space<vmem>>, vector<1x128xf32>
    %29 = vector.broadcast %28 : vector<1x128xf32> to vector<64x128xf32>
    %30 = arith.addf %27, %29 : vector<64x128xf32>
    %c0_14 = arith.constant 0 : index
    %c0_15 = arith.constant 0 : index
    %31 = vector.load %arg7[%c0_14, %c0_15] : memref<32x128xbf16, #tpu.memory_space<vmem>>, vector<32x128xbf16>
    %c0_16 = arith.constant 0 : index
    %c0_17 = arith.constant 0 : index
    %32 = vector.load %arg8[%c0_16, %c0_17] : memref<32x128xbf16, #tpu.memory_space<vmem>>, vector<32x128xbf16>
    %c0_18 = arith.constant 0 : index
    %c0_19 = arith.constant 0 : index
    %33 = vector.load %arg10[%c0_18, %c0_19] : memref<32x128xbf16, #tpu.memory_space<vmem>>, vector<32x128xbf16>
    %c0_20 = arith.constant 0 : index
    %c0_21 = arith.constant 0 : index
    %34 = vector.load %arg9[%c0_20, %c0_21] : memref<1x128xf32, #tpu.memory_space<vmem>>, vector<1x128xf32>
    %c0_22 = arith.constant 0 : index
    %c0_23 = arith.constant 0 : index
    %35 = vector.load %arg2[%c0_22, %c0_23] : memref<8x1xf32, #tpu.memory_space<vmem>>, vector<8x1xf32>
    %cst_24 = arith.constant 0.000000e+00 : f32
    %36 = vector.broadcast %cst_24 : f32 to vector<8x32xf32>
    %37 = vector.extract_strided_slice %30 {offsets = [0, 0], sizes = [8, 128], strides = [1, 1]} : vector<64x128xf32> to vector<8x128xf32>
    %38 = arith.truncf %36 : vector<8x32xf32> to vector<8x32xbf16>
    %cst_25 = arith.constant dense<0.000000e+00> : vector<8x128xf32>
    %39 = tpu.matmul %38, %31, %cst_25 {dimension_numbers = #tpu.dot_dimension_numbers<[1], [0], [0], [1], [0, 0, 1, 1], [], []>} : vector<8x32xbf16>, vector<32x128xbf16>, vector<8x128xf32> -> vector<8x128xf32>
    %40 = arith.addf %37, %39 : vector<8x128xf32>
    %41 = vector.extract_strided_slice %40 {offsets = [0, 0], sizes = [8, 32], strides = [1, 1]} : vector<8x128xf32> to vector<8x32xf32>
    %42 = arith.negf %41 : vector<8x32xf32>
    %43 = math.exp %42 : vector<8x32xf32>
    %cst_26 = arith.constant 1.000000e+00 : f32
    %44 = vector.broadcast %cst_26 : f32 to vector<8x32xf32>
    %45 = arith.addf %44, %43 : vector<8x32xf32>
    %46 = arith.divf %44, %45 : vector<8x32xf32>
    %47 = vector.extract_strided_slice %40 {offsets = [0, 32], sizes = [8, 32], strides = [1, 1]} : vector<8x128xf32> to vector<8x32xf32>
    %48 = arith.negf %47 : vector<8x32xf32>
    %49 = math.exp %48 : vector<8x32xf32>
    %cst_27 = arith.constant 1.000000e+00 : f32
    %50 = vector.broadcast %cst_27 : f32 to vector<8x32xf32>
    %51 = arith.addf %50, %49 : vector<8x32xf32>
    %52 = arith.divf %50, %51 : vector<8x32xf32>
    %53 = vector.extract_strided_slice %40 {offsets = [0, 64], sizes = [8, 32], strides = [1, 1]} : vector<8x128xf32> to vector<8x32xf32>
    %54 = math.tanh %53 : vector<8x32xf32>
    %55 = vector.extract_strided_slice %40 {offsets = [0, 96], sizes = [8, 32], strides = [1, 1]} : vector<8x128xf32> to vector<8x32xf32>
    %56 = arith.negf %55 : vector<8x32xf32>
    %57 = math.exp %56 : vector<8x32xf32>
    %cst_28 = arith.constant 1.000000e+00 : f32
    %58 = vector.broadcast %cst_28 : f32 to vector<8x32xf32>
    %59 = arith.addf %58, %57 : vector<8x32xf32>
    %60 = arith.divf %58, %59 : vector<8x32xf32>
    %61 = arith.mulf %52, %36 : vector<8x32xf32>
    %62 = arith.mulf %46, %54 : vector<8x32xf32>
    %63 = arith.addf %61, %62 : vector<8x32xf32>
    %64 = math.tanh %63 : vector<8x32xf32>
    %65 = arith.mulf %60, %64 : vector<8x32xf32>
    %66 = vector.extract_strided_slice %30 {offsets = [8, 0], sizes = [8, 128], strides = [1, 1]} : vector<64x128xf32> to vector<8x128xf32>
    %67 = arith.truncf %65 : vector<8x32xf32> to vector<8x32xbf16>
    %cst_29 = arith.constant dense<0.000000e+00> : vector<8x128xf32>
    %68 = tpu.matmul %67, %31, %cst_29 {dimension_numbers = #tpu.dot_dimension_numbers<[1], [0], [0], [1], [0, 0, 1, 1], [], []>} : vector<8x32xbf16>, vector<32x128xbf16>, vector<8x128xf32> -> vector<8x128xf32>
    %69 = arith.addf %66, %68 : vector<8x128xf32>
    %70 = arith.truncf %65 : vector<8x32xf32> to vector<8x32xbf16>
    %cst_30 = arith.constant dense<0.000000e+00> : vector<8x128xf32>
    %71 = tpu.matmul %70, %32, %cst_30 {dimension_numbers = #tpu.dot_dimension_numbers<[1], [0], [0], [1], [0, 0, 1, 1], [], []>} : vector<8x32xbf16>, vector<32x128xbf16>, vector<8x128xf32> -> vector<8x128xf32>
    %72 = vector.broadcast %34 : vector<1x128xf32> to vector<8x128xf32>
    %73 = arith.addf %71, %72 : vector<8x128xf32>
    %74 = arith.truncf %36 : vector<8x32xf32> to vector<8x32xbf16>
    %cst_31 = arith.constant dense<0.000000e+00> : vector<8x128xf32>
    %75 = tpu.matmul %74, %33, %cst_31 {dimension_numbers = #tpu.dot_dimension_numbers<[1], [0], [0], [1], [0, 0, 1, 1], [], []>} : vector<8x32xbf16>, vector<32x128xbf16>, vector<8x128xf32> -> vector<8x128xf32>
    %76 = arith.addf %73, %75 : vector<8x128xf32>
    %77 = vector.extract_strided_slice %76 {offsets = [0, 0], sizes = [8, 32], strides = [1, 1]} : vector<8x128xf32> to vector<8x32xf32>
    %78 = arith.negf %77 : vector<8x32xf32>
    %79 = math.exp %78 : vector<8x32xf32>
    %cst_32 = arith.constant 1.000000e+00 : f32
    %80 = vector.broadcast %cst_32 : f32 to vector<8x32xf32>
    %81 = arith.addf %80, %79 : vector<8x32xf32>
    %82 = arith.divf %80, %81 : vector<8x32xf32>
    %83 = vector.extract_strided_slice %76 {offsets = [0, 32], sizes = [8, 32], strides = [1, 1]} : vector<8x128xf32> to vector<8x32xf32>
    %84 = arith.negf %83 : vector<8x32xf32>
    %85 = math.exp %84 : vector<8x32xf32>
    %cst_33 = arith.constant 1.000000e+00 : f32
    %86 = vector.broadcast %cst_33 : f32 to vector<8x32xf32>
    %87 = arith.addf %86, %85 : vector<8x32xf32>
    %88 = arith.divf %86, %87 : vector<8x32xf32>
    %89 = vector.extract_strided_slice %76 {offsets = [0, 64], sizes = [8, 32], strides = [1, 1]} : vector<8x128xf32> to vector<8x32xf32>
    %90 = math.tanh %89 : vector<8x32xf32>
    %91 = vector.extract_strided_slice %76 {offsets = [0, 96], sizes = [8, 32], strides = [1, 1]} : vector<8x128xf32> to vector<8x32xf32>
    %92 = arith.negf %91 : vector<8x32xf32>
    %93 = math.exp %92 : vector<8x32xf32>
    %cst_34 = arith.constant 1.000000e+00 : f32
    %94 = vector.broadcast %cst_34 : f32 to vector<8x32xf32>
    %95 = arith.addf %94, %93 : vector<8x32xf32>
    %96 = arith.divf %94, %95 : vector<8x32xf32>
    %97 = arith.mulf %88, %36 : vector<8x32xf32>
    %98 = arith.mulf %82, %90 : vector<8x32xf32>
    %99 = arith.addf %97, %98 : vector<8x32xf32>
    %100 = math.tanh %99 : vector<8x32xf32>
    %101 = arith.mulf %96, %100 : vector<8x32xf32>
    %cst_35 = arith.constant 0.000000e+00 : f32
    %102 = vector.broadcast %cst_35 : f32 to vector<8x1xf32>
    %103 = arith.cmpf ogt, %35, %102 : vector<8x1xf32>
    %104 = arith.extui %103 : vector<8x1xi1> to vector<8x1xi32>
    %105 = arith.sitofp %104 : vector<8x1xi32> to vector<8x1xf32>
    %106 = vector.broadcast %105 : vector<8x1xf32> to vector<8x32xf32>
    %107 = arith.mulf %101, %106 : vector<8x32xf32>
    %108 = vector.extract_strided_slice %69 {offsets = [0, 0], sizes = [8, 32], strides = [1, 1]} : vector<8x128xf32> to vector<8x32xf32>
    %109 = arith.negf %108 : vector<8x32xf32>
    %110 = math.exp %109 : vector<8x32xf32>
    %cst_36 = arith.constant 1.000000e+00 : f32
    %111 = vector.broadcast %cst_36 : f32 to vector<8x32xf32>
    %112 = arith.addf %111, %110 : vector<8x32xf32>
    %113 = arith.divf %111, %112 : vector<8x32xf32>
    %114 = vector.extract_strided_slice %69 {offsets = [0, 32], sizes = [8, 32], strides = [1, 1]} : vector<8x128xf32> to vector<8x32xf32>
    %115 = arith.negf %114 : vector<8x32xf32>
    %116 = math.exp %115 : vector<8x32xf32>
    %cst_37 = arith.constant 1.000000e+00 : f32
    %117 = vector.broadcast %cst_37 : f32 to vector<8x32xf32>
    %118 = arith.addf %117, %116 : vector<8x32xf32>
    %119 = arith.divf %117, %118 : vector<8x32xf32>
    %120 = vector.extract_strided_slice %69 {offsets = [0, 64], sizes = [8, 32], strides = [1, 1]} : vector<8x128xf32> to vector<8x32xf32>
    %121 = math.tanh %120 : vector<8x32xf32>
    %122 = vector.extract_strided_slice %69 {offsets = [0, 96], sizes = [8, 32], strides = [1, 1]} : vector<8x128xf32> to vector<8x32xf32>
    %123 = arith.negf %122 : vector<8x32xf32>
    %124 = math.exp %123 : vector<8x32xf32>
    %cst_38 = arith.constant 1.000000e+00 : f32
    %125 = vector.broadcast %cst_38 : f32 to vector<8x32xf32>
    %126 = arith.addf %125, %124 : vector<8x32xf32>
    %127 = arith.divf %125, %126 : vector<8x32xf32>
    %128 = arith.mulf %119, %63 : vector<8x32xf32>
    %129 = arith.mulf %113, %121 : vector<8x32xf32>
    %130 = arith.addf %128, %129 : vector<8x32xf32>
    %131 = math.tanh %130 : vector<8x32xf32>
    %132 = arith.mulf %127, %131 : vector<8x32xf32>
    %133 = vector.extract_strided_slice %30 {offsets = [16, 0], sizes = [8, 128], strides = [1, 1]} : vector<64x128xf32> to vector<8x128xf32>
    %134 = arith.truncf %132 : vector<8x32xf32> to vector<8x32xbf16>
    %cst_39 = arith.constant dense<0.000000e+00> : vector<8x128xf32>
    %135 = tpu.matmul %134, %31, %cst_39 {dimension_numbers = #tpu.dot_dimension_numbers<[1], [0], [0], [1], [0, 0, 1, 1], [], []>} : vector<8x32xbf16>, vector<32x128xbf16>, vector<8x128xf32> -> vector<8x128xf32>
    %136 = arith.addf %133, %135 : vector<8x128xf32>
    %137 = arith.truncf %132 : vector<8x32xf32> to vector<8x32xbf16>
    %cst_40 = arith.constant dense<0.000000e+00> : vector<8x128xf32>
    %138 = tpu.matmul %137, %32, %cst_40 {dimension_numbers = #tpu.dot_dimension_numbers<[1], [0], [0], [1], [0, 0, 1, 1], [], []>} : vector<8x32xbf16>, vector<32x128xbf16>, vector<8x128xf32> -> vector<8x128xf32>
    %139 = vector.broadcast %34 : vector<1x128xf32> to vector<8x128xf32>
    %140 = arith.addf %138, %139 : vector<8x128xf32>
    %141 = arith.truncf %101 : vector<8x32xf32> to vector<8x32xbf16>
    %cst_41 = arith.constant dense<0.000000e+00> : vector<8x128xf32>
    %142 = tpu.matmul %141, %33, %cst_41 {dimension_numbers = #tpu.dot_dimension_numbers<[1], [0], [0], [1], [0, 0, 1, 1], [], []>} : vector<8x32xbf16>, vector<32x128xbf16>, vector<8x128xf32> -> vector<8x128xf32>
    %143 = arith.addf %140, %142 : vector<8x128xf32>
    %144 = vector.extract_strided_slice %143 {offsets = [0, 0], sizes = [8, 32], strides = [1, 1]} : vector<8x128xf32> to vector<8x32xf32>
    %145 = arith.negf %144 : vector<8x32xf32>
    %146 = math.exp %145 : vector<8x32xf32>
    %cst_42 = arith.constant 1.000000e+00 : f32
    %147 = vector.broadcast %cst_42 : f32 to vector<8x32xf32>
    %148 = arith.addf %147, %146 : vector<8x32xf32>
    %149 = arith.divf %147, %148 : vector<8x32xf32>
    %150 = vector.extract_strided_slice %143 {offsets = [0, 32], sizes = [8, 32], strides = [1, 1]} : vector<8x128xf32> to vector<8x32xf32>
    %151 = arith.negf %150 : vector<8x32xf32>
    %152 = math.exp %151 : vector<8x32xf32>
    %cst_43 = arith.constant 1.000000e+00 : f32
    %153 = vector.broadcast %cst_43 : f32 to vector<8x32xf32>
    %154 = arith.addf %153, %152 : vector<8x32xf32>
    %155 = arith.divf %153, %154 : vector<8x32xf32>
    %156 = vector.extract_strided_slice %143 {offsets = [0, 64], sizes = [8, 32], strides = [1, 1]} : vector<8x128xf32> to vector<8x32xf32>
    %157 = math.tanh %156 : vector<8x32xf32>
    %158 = vector.extract_strided_slice %143 {offsets = [0, 96], sizes = [8, 32], strides = [1, 1]} : vector<8x128xf32> to vector<8x32xf32>
    %159 = arith.negf %158 : vector<8x32xf32>
    %160 = math.exp %159 : vector<8x32xf32>
    %cst_44 = arith.constant 1.000000e+00 : f32
    %161 = vector.broadcast %cst_44 : f32 to vector<8x32xf32>
    %162 = arith.addf %161, %160 : vector<8x32xf32>
    %163 = arith.divf %161, %162 : vector<8x32xf32>
    %164 = arith.mulf %155, %99 : vector<8x32xf32>
    %165 = arith.mulf %149, %157 : vector<8x32xf32>
    %166 = arith.addf %164, %165 : vector<8x32xf32>
    %167 = math.tanh %166 : vector<8x32xf32>
    %168 = arith.mulf %163, %167 : vector<8x32xf32>
    %cst_45 = arith.constant 1.000000e+00 : f32
    %169 = vector.broadcast %cst_45 : f32 to vector<8x1xf32>
    %170 = arith.cmpf ogt, %35, %169 : vector<8x1xf32>
    %171 = arith.extui %170 : vector<8x1xi1> to vector<8x1xi32>
    %172 = arith.sitofp %171 : vector<8x1xi32> to vector<8x1xf32>
    %173 = vector.broadcast %172 : vector<8x1xf32> to vector<8x32xf32>
    %174 = arith.mulf %168, %173 : vector<8x32xf32>
    %175 = vector.extract_strided_slice %136 {offsets = [0, 0], sizes = [8, 32], strides = [1, 1]} : vector<8x128xf32> to vector<8x32xf32>
    %176 = arith.negf %175 : vector<8x32xf32>
    %177 = math.exp %176 : vector<8x32xf32>
    %cst_46 = arith.constant 1.000000e+00 : f32
    %178 = vector.broadcast %cst_46 : f32 to vector<8x32xf32>
    %179 = arith.addf %178, %177 : vector<8x32xf32>
    %180 = arith.divf %178, %179 : vector<8x32xf32>
    %181 = vector.extract_strided_slice %136 {offsets = [0, 32], sizes = [8, 32], strides = [1, 1]} : vector<8x128xf32> to vector<8x32xf32>
    %182 = arith.negf %181 : vector<8x32xf32>
    %183 = math.exp %182 : vector<8x32xf32>
    %cst_47 = arith.constant 1.000000e+00 : f32
    %184 = vector.broadcast %cst_47 : f32 to vector<8x32xf32>
    %185 = arith.addf %184, %183 : vector<8x32xf32>
    %186 = arith.divf %184, %185 : vector<8x32xf32>
    %187 = vector.extract_strided_slice %136 {offsets = [0, 64], sizes = [8, 32], strides = [1, 1]} : vector<8x128xf32> to vector<8x32xf32>
    %188 = math.tanh %187 : vector<8x32xf32>
    %189 = vector.extract_strided_slice %136 {offsets = [0, 96], sizes = [8, 32], strides = [1, 1]} : vector<8x128xf32> to vector<8x32xf32>
    %190 = arith.negf %189 : vector<8x32xf32>
    %191 = math.exp %190 : vector<8x32xf32>
    %cst_48 = arith.constant 1.000000e+00 : f32
    %192 = vector.broadcast %cst_48 : f32 to vector<8x32xf32>
    %193 = arith.addf %192, %191 : vector<8x32xf32>
    %194 = arith.divf %192, %193 : vector<8x32xf32>
    %195 = arith.mulf %186, %130 : vector<8x32xf32>
    %196 = arith.mulf %180, %188 : vector<8x32xf32>
    %197 = arith.addf %195, %196 : vector<8x32xf32>
    %198 = math.tanh %197 : vector<8x32xf32>
    %199 = arith.mulf %194, %198 : vector<8x32xf32>
    %200 = vector.extract_strided_slice %30 {offsets = [24, 0], sizes = [8, 128], strides = [1, 1]} : vector<64x128xf32> to vector<8x128xf32>
    %201 = arith.truncf %199 : vector<8x32xf32> to vector<8x32xbf16>
    %cst_49 = arith.constant dense<0.000000e+00> : vector<8x128xf32>
    %202 = tpu.matmul %201, %31, %cst_49 {dimension_numbers = #tpu.dot_dimension_numbers<[1], [0], [0], [1], [0, 0, 1, 1], [], []>} : vector<8x32xbf16>, vector<32x128xbf16>, vector<8x128xf32> -> vector<8x128xf32>
    %203 = arith.addf %200, %202 : vector<8x128xf32>
    %204 = arith.truncf %199 : vector<8x32xf32> to vector<8x32xbf16>
    %cst_50 = arith.constant dense<0.000000e+00> : vector<8x128xf32>
    %205 = tpu.matmul %204, %32, %cst_50 {dimension_numbers = #tpu.dot_dimension_numbers<[1], [0], [0], [1], [0, 0, 1, 1], [], []>} : vector<8x32xbf16>, vector<32x128xbf16>, vector<8x128xf32> -> vector<8x128xf32>
    %206 = vector.broadcast %34 : vector<1x128xf32> to vector<8x128xf32>
    %207 = arith.addf %205, %206 : vector<8x128xf32>
    %208 = arith.truncf %168 : vector<8x32xf32> to vector<8x32xbf16>
    %cst_51 = arith.constant dense<0.000000e+00> : vector<8x128xf32>
    %209 = tpu.matmul %208, %33, %cst_51 {dimension_numbers = #tpu.dot_dimension_numbers<[1], [0], [0], [1], [0, 0, 1, 1], [], []>} : vector<8x32xbf16>, vector<32x128xbf16>, vector<8x128xf32> -> vector<8x128xf32>
    %210 = arith.addf %207, %209 : vector<8x128xf32>
    %211 = vector.extract_strided_slice %210 {offsets = [0, 0], sizes = [8, 32], strides = [1, 1]} : vector<8x128xf32> to vector<8x32xf32>
    %212 = arith.negf %211 : vector<8x32xf32>
    %213 = math.exp %212 : vector<8x32xf32>
    %cst_52 = arith.constant 1.000000e+00 : f32
    %214 = vector.broadcast %cst_52 : f32 to vector<8x32xf32>
    %215 = arith.addf %214, %213 : vector<8x32xf32>
    %216 = arith.divf %214, %215 : vector<8x32xf32>
    %217 = vector.extract_strided_slice %210 {offsets = [0, 32], sizes = [8, 32], strides = [1, 1]} : vector<8x128xf32> to vector<8x32xf32>
    %218 = arith.negf %217 : vector<8x32xf32>
    %219 = math.exp %218 : vector<8x32xf32>
    %cst_53 = arith.constant 1.000000e+00 : f32
    %220 = vector.broadcast %cst_53 : f32 to vector<8x32xf32>
    %221 = arith.addf %220, %219 : vector<8x32xf32>
    %222 = arith.divf %220, %221 : vector<8x32xf32>
    %223 = vector.extract_strided_slice %210 {offsets = [0, 64], sizes = [8, 32], strides = [1, 1]} : vector<8x128xf32> to vector<8x32xf32>
    %224 = math.tanh %223 : vector<8x32xf32>
    %225 = vector.extract_strided_slice %210 {offsets = [0, 96], sizes = [8, 32], strides = [1, 1]} : vector<8x128xf32> to vector<8x32xf32>
    %226 = arith.negf %225 : vector<8x32xf32>
    %227 = math.exp %226 : vector<8x32xf32>
    %cst_54 = arith.constant 1.000000e+00 : f32
    %228 = vector.broadcast %cst_54 : f32 to vector<8x32xf32>
    %229 = arith.addf %228, %227 : vector<8x32xf32>
    %230 = arith.divf %228, %229 : vector<8x32xf32>
    %231 = arith.mulf %222, %166 : vector<8x32xf32>
    %232 = arith.mulf %216, %224 : vector<8x32xf32>
    %233 = arith.addf %231, %232 : vector<8x32xf32>
    %234 = math.tanh %233 : vector<8x32xf32>
    %235 = arith.mulf %230, %234 : vector<8x32xf32>
    %cst_55 = arith.constant 2.000000e+00 : f32
    %236 = vector.broadcast %cst_55 : f32 to vector<8x1xf32>
    %237 = arith.cmpf ogt, %35, %236 : vector<8x1xf32>
    %238 = arith.extui %237 : vector<8x1xi1> to vector<8x1xi32>
    %239 = arith.sitofp %238 : vector<8x1xi32> to vector<8x1xf32>
    %240 = vector.broadcast %239 : vector<8x1xf32> to vector<8x32xf32>
    %241 = arith.mulf %235, %240 : vector<8x32xf32>
    %242 = vector.extract_strided_slice %203 {offsets = [0, 0], sizes = [8, 32], strides = [1, 1]} : vector<8x128xf32> to vector<8x32xf32>
    %243 = arith.negf %242 : vector<8x32xf32>
    %244 = math.exp %243 : vector<8x32xf32>
    %cst_56 = arith.constant 1.000000e+00 : f32
    %245 = vector.broadcast %cst_56 : f32 to vector<8x32xf32>
    %246 = arith.addf %245, %244 : vector<8x32xf32>
    %247 = arith.divf %245, %246 : vector<8x32xf32>
    %248 = vector.extract_strided_slice %203 {offsets = [0, 32], sizes = [8, 32], strides = [1, 1]} : vector<8x128xf32> to vector<8x32xf32>
    %249 = arith.negf %248 : vector<8x32xf32>
    %250 = math.exp %249 : vector<8x32xf32>
    %cst_57 = arith.constant 1.000000e+00 : f32
    %251 = vector.broadcast %cst_57 : f32 to vector<8x32xf32>
    %252 = arith.addf %251, %250 : vector<8x32xf32>
    %253 = arith.divf %251, %252 : vector<8x32xf32>
    %254 = vector.extract_strided_slice %203 {offsets = [0, 64], sizes = [8, 32], strides = [1, 1]} : vector<8x128xf32> to vector<8x32xf32>
    %255 = math.tanh %254 : vector<8x32xf32>
    %256 = vector.extract_strided_slice %203 {offsets = [0, 96], sizes = [8, 32], strides = [1, 1]} : vector<8x128xf32> to vector<8x32xf32>
    %257 = arith.negf %256 : vector<8x32xf32>
    %258 = math.exp %257 : vector<8x32xf32>
    %cst_58 = arith.constant 1.000000e+00 : f32
    %259 = vector.broadcast %cst_58 : f32 to vector<8x32xf32>
    %260 = arith.addf %259, %258 : vector<8x32xf32>
    %261 = arith.divf %259, %260 : vector<8x32xf32>
    %262 = arith.mulf %253, %197 : vector<8x32xf32>
    %263 = arith.mulf %247, %255 : vector<8x32xf32>
    %264 = arith.addf %262, %263 : vector<8x32xf32>
    %265 = math.tanh %264 : vector<8x32xf32>
    %266 = arith.mulf %261, %265 : vector<8x32xf32>
    %267 = vector.extract_strided_slice %30 {offsets = [32, 0], sizes = [8, 128], strides = [1, 1]} : vector<64x128xf32> to vector<8x128xf32>
    %268 = arith.truncf %266 : vector<8x32xf32> to vector<8x32xbf16>
    %cst_59 = arith.constant dense<0.000000e+00> : vector<8x128xf32>
    %269 = tpu.matmul %268, %31, %cst_59 {dimension_numbers = #tpu.dot_dimension_numbers<[1], [0], [0], [1], [0, 0, 1, 1], [], []>} : vector<8x32xbf16>, vector<32x128xbf16>, vector<8x128xf32> -> vector<8x128xf32>
    %270 = arith.addf %267, %269 : vector<8x128xf32>
    %271 = arith.truncf %266 : vector<8x32xf32> to vector<8x32xbf16>
    %cst_60 = arith.constant dense<0.000000e+00> : vector<8x128xf32>
    %272 = tpu.matmul %271, %32, %cst_60 {dimension_numbers = #tpu.dot_dimension_numbers<[1], [0], [0], [1], [0, 0, 1, 1], [], []>} : vector<8x32xbf16>, vector<32x128xbf16>, vector<8x128xf32> -> vector<8x128xf32>
    %273 = vector.broadcast %34 : vector<1x128xf32> to vector<8x128xf32>
    %274 = arith.addf %272, %273 : vector<8x128xf32>
    %275 = arith.truncf %235 : vector<8x32xf32> to vector<8x32xbf16>
    %cst_61 = arith.constant dense<0.000000e+00> : vector<8x128xf32>
    %276 = tpu.matmul %275, %33, %cst_61 {dimension_numbers = #tpu.dot_dimension_numbers<[1], [0], [0], [1], [0, 0, 1, 1], [], []>} : vector<8x32xbf16>, vector<32x128xbf16>, vector<8x128xf32> -> vector<8x128xf32>
    %277 = arith.addf %274, %276 : vector<8x128xf32>
    %278 = vector.extract_strided_slice %277 {offsets = [0, 0], sizes = [8, 32], strides = [1, 1]} : vector<8x128xf32> to vector<8x32xf32>
    %279 = arith.negf %278 : vector<8x32xf32>
    %280 = math.exp %279 : vector<8x32xf32>
    %cst_62 = arith.constant 1.000000e+00 : f32
    %281 = vector.broadcast %cst_62 : f32 to vector<8x32xf32>
    %282 = arith.addf %281, %280 : vector<8x32xf32>
    %283 = arith.divf %281, %282 : vector<8x32xf32>
    %284 = vector.extract_strided_slice %277 {offsets = [0, 32], sizes = [8, 32], strides = [1, 1]} : vector<8x128xf32> to vector<8x32xf32>
    %285 = arith.negf %284 : vector<8x32xf32>
    %286 = math.exp %285 : vector<8x32xf32>
    %cst_63 = arith.constant 1.000000e+00 : f32
    %287 = vector.broadcast %cst_63 : f32 to vector<8x32xf32>
    %288 = arith.addf %287, %286 : vector<8x32xf32>
    %289 = arith.divf %287, %288 : vector<8x32xf32>
    %290 = vector.extract_strided_slice %277 {offsets = [0, 64], sizes = [8, 32], strides = [1, 1]} : vector<8x128xf32> to vector<8x32xf32>
    %291 = math.tanh %290 : vector<8x32xf32>
    %292 = vector.extract_strided_slice %277 {offsets = [0, 96], sizes = [8, 32], strides = [1, 1]} : vector<8x128xf32> to vector<8x32xf32>
    %293 = arith.negf %292 : vector<8x32xf32>
    %294 = math.exp %293 : vector<8x32xf32>
    %cst_64 = arith.constant 1.000000e+00 : f32
    %295 = vector.broadcast %cst_64 : f32 to vector<8x32xf32>
    %296 = arith.addf %295, %294 : vector<8x32xf32>
    %297 = arith.divf %295, %296 : vector<8x32xf32>
    %298 = arith.mulf %289, %233 : vector<8x32xf32>
    %299 = arith.mulf %283, %291 : vector<8x32xf32>
    %300 = arith.addf %298, %299 : vector<8x32xf32>
    %301 = math.tanh %300 : vector<8x32xf32>
    %302 = arith.mulf %297, %301 : vector<8x32xf32>
    %cst_65 = arith.constant 3.000000e+00 : f32
    %303 = vector.broadcast %cst_65 : f32 to vector<8x1xf32>
    %304 = arith.cmpf ogt, %35, %303 : vector<8x1xf32>
    %305 = arith.extui %304 : vector<8x1xi1> to vector<8x1xi32>
    %306 = arith.sitofp %305 : vector<8x1xi32> to vector<8x1xf32>
    %307 = vector.broadcast %306 : vector<8x1xf32> to vector<8x32xf32>
    %308 = arith.mulf %302, %307 : vector<8x32xf32>
    %309 = vector.extract_strided_slice %270 {offsets = [0, 0], sizes = [8, 32], strides = [1, 1]} : vector<8x128xf32> to vector<8x32xf32>
    %310 = arith.negf %309 : vector<8x32xf32>
    %311 = math.exp %310 : vector<8x32xf32>
    %cst_66 = arith.constant 1.000000e+00 : f32
    %312 = vector.broadcast %cst_66 : f32 to vector<8x32xf32>
    %313 = arith.addf %312, %311 : vector<8x32xf32>
    %314 = arith.divf %312, %313 : vector<8x32xf32>
    %315 = vector.extract_strided_slice %270 {offsets = [0, 32], sizes = [8, 32], strides = [1, 1]} : vector<8x128xf32> to vector<8x32xf32>
    %316 = arith.negf %315 : vector<8x32xf32>
    %317 = math.exp %316 : vector<8x32xf32>
    %cst_67 = arith.constant 1.000000e+00 : f32
    %318 = vector.broadcast %cst_67 : f32 to vector<8x32xf32>
    %319 = arith.addf %318, %317 : vector<8x32xf32>
    %320 = arith.divf %318, %319 : vector<8x32xf32>
    %321 = vector.extract_strided_slice %270 {offsets = [0, 64], sizes = [8, 32], strides = [1, 1]} : vector<8x128xf32> to vector<8x32xf32>
    %322 = math.tanh %321 : vector<8x32xf32>
    %323 = vector.extract_strided_slice %270 {offsets = [0, 96], sizes = [8, 32], strides = [1, 1]} : vector<8x128xf32> to vector<8x32xf32>
    %324 = arith.negf %323 : vector<8x32xf32>
    %325 = math.exp %324 : vector<8x32xf32>
    %cst_68 = arith.constant 1.000000e+00 : f32
    %326 = vector.broadcast %cst_68 : f32 to vector<8x32xf32>
    %327 = arith.addf %326, %325 : vector<8x32xf32>
    %328 = arith.divf %326, %327 : vector<8x32xf32>
    %329 = arith.mulf %320, %264 : vector<8x32xf32>
    %330 = arith.mulf %314, %322 : vector<8x32xf32>
    %331 = arith.addf %329, %330 : vector<8x32xf32>
    %332 = math.tanh %331 : vector<8x32xf32>
    %333 = arith.mulf %328, %332 : vector<8x32xf32>
    %334 = vector.extract_strided_slice %30 {offsets = [40, 0], sizes = [8, 128], strides = [1, 1]} : vector<64x128xf32> to vector<8x128xf32>
    %335 = arith.truncf %333 : vector<8x32xf32> to vector<8x32xbf16>
    %cst_69 = arith.constant dense<0.000000e+00> : vector<8x128xf32>
    %336 = tpu.matmul %335, %31, %cst_69 {dimension_numbers = #tpu.dot_dimension_numbers<[1], [0], [0], [1], [0, 0, 1, 1], [], []>} : vector<8x32xbf16>, vector<32x128xbf16>, vector<8x128xf32> -> vector<8x128xf32>
    %337 = arith.addf %334, %336 : vector<8x128xf32>
    %338 = arith.truncf %333 : vector<8x32xf32> to vector<8x32xbf16>
    %cst_70 = arith.constant dense<0.000000e+00> : vector<8x128xf32>
    %339 = tpu.matmul %338, %32, %cst_70 {dimension_numbers = #tpu.dot_dimension_numbers<[1], [0], [0], [1], [0, 0, 1, 1], [], []>} : vector<8x32xbf16>, vector<32x128xbf16>, vector<8x128xf32> -> vector<8x128xf32>
    %340 = vector.broadcast %34 : vector<1x128xf32> to vector<8x128xf32>
    %341 = arith.addf %339, %340 : vector<8x128xf32>
    %342 = arith.truncf %302 : vector<8x32xf32> to vector<8x32xbf16>
    %cst_71 = arith.constant dense<0.000000e+00> : vector<8x128xf32>
    %343 = tpu.matmul %342, %33, %cst_71 {dimension_numbers = #tpu.dot_dimension_numbers<[1], [0], [0], [1], [0, 0, 1, 1], [], []>} : vector<8x32xbf16>, vector<32x128xbf16>, vector<8x128xf32> -> vector<8x128xf32>
    %344 = arith.addf %341, %343 : vector<8x128xf32>
    %345 = vector.extract_strided_slice %344 {offsets = [0, 0], sizes = [8, 32], strides = [1, 1]} : vector<8x128xf32> to vector<8x32xf32>
    %346 = arith.negf %345 : vector<8x32xf32>
    %347 = math.exp %346 : vector<8x32xf32>
    %cst_72 = arith.constant 1.000000e+00 : f32
    %348 = vector.broadcast %cst_72 : f32 to vector<8x32xf32>
    %349 = arith.addf %348, %347 : vector<8x32xf32>
    %350 = arith.divf %348, %349 : vector<8x32xf32>
    %351 = vector.extract_strided_slice %344 {offsets = [0, 32], sizes = [8, 32], strides = [1, 1]} : vector<8x128xf32> to vector<8x32xf32>
    %352 = arith.negf %351 : vector<8x32xf32>
    %353 = math.exp %352 : vector<8x32xf32>
    %cst_73 = arith.constant 1.000000e+00 : f32
    %354 = vector.broadcast %cst_73 : f32 to vector<8x32xf32>
    %355 = arith.addf %354, %353 : vector<8x32xf32>
    %356 = arith.divf %354, %355 : vector<8x32xf32>
    %357 = vector.extract_strided_slice %344 {offsets = [0, 64], sizes = [8, 32], strides = [1, 1]} : vector<8x128xf32> to vector<8x32xf32>
    %358 = math.tanh %357 : vector<8x32xf32>
    %359 = vector.extract_strided_slice %344 {offsets = [0, 96], sizes = [8, 32], strides = [1, 1]} : vector<8x128xf32> to vector<8x32xf32>
    %360 = arith.negf %359 : vector<8x32xf32>
    %361 = math.exp %360 : vector<8x32xf32>
    %cst_74 = arith.constant 1.000000e+00 : f32
    %362 = vector.broadcast %cst_74 : f32 to vector<8x32xf32>
    %363 = arith.addf %362, %361 : vector<8x32xf32>
    %364 = arith.divf %362, %363 : vector<8x32xf32>
    %365 = arith.mulf %356, %300 : vector<8x32xf32>
    %366 = arith.mulf %350, %358 : vector<8x32xf32>
    %367 = arith.addf %365, %366 : vector<8x32xf32>
    %368 = math.tanh %367 : vector<8x32xf32>
    %369 = arith.mulf %364, %368 : vector<8x32xf32>
    %cst_75 = arith.constant 4.000000e+00 : f32
    %370 = vector.broadcast %cst_75 : f32 to vector<8x1xf32>
    %371 = arith.cmpf ogt, %35, %370 : vector<8x1xf32>
    %372 = arith.extui %371 : vector<8x1xi1> to vector<8x1xi32>
    %373 = arith.sitofp %372 : vector<8x1xi32> to vector<8x1xf32>
    %374 = vector.broadcast %373 : vector<8x1xf32> to vector<8x32xf32>
    %375 = arith.mulf %369, %374 : vector<8x32xf32>
    %376 = vector.extract_strided_slice %337 {offsets = [0, 0], sizes = [8, 32], strides = [1, 1]} : vector<8x128xf32> to vector<8x32xf32>
    %377 = arith.negf %376 : vector<8x32xf32>
    %378 = math.exp %377 : vector<8x32xf32>
    %cst_76 = arith.constant 1.000000e+00 : f32
    %379 = vector.broadcast %cst_76 : f32 to vector<8x32xf32>
    %380 = arith.addf %379, %378 : vector<8x32xf32>
    %381 = arith.divf %379, %380 : vector<8x32xf32>
    %382 = vector.extract_strided_slice %337 {offsets = [0, 32], sizes = [8, 32], strides = [1, 1]} : vector<8x128xf32> to vector<8x32xf32>
    %383 = arith.negf %382 : vector<8x32xf32>
    %384 = math.exp %383 : vector<8x32xf32>
    %cst_77 = arith.constant 1.000000e+00 : f32
    %385 = vector.broadcast %cst_77 : f32 to vector<8x32xf32>
    %386 = arith.addf %385, %384 : vector<8x32xf32>
    %387 = arith.divf %385, %386 : vector<8x32xf32>
    %388 = vector.extract_strided_slice %337 {offsets = [0, 64], sizes = [8, 32], strides = [1, 1]} : vector<8x128xf32> to vector<8x32xf32>
    %389 = math.tanh %388 : vector<8x32xf32>
    %390 = vector.extract_strided_slice %337 {offsets = [0, 96], sizes = [8, 32], strides = [1, 1]} : vector<8x128xf32> to vector<8x32xf32>
    %391 = arith.negf %390 : vector<8x32xf32>
    %392 = math.exp %391 : vector<8x32xf32>
    %cst_78 = arith.constant 1.000000e+00 : f32
    %393 = vector.broadcast %cst_78 : f32 to vector<8x32xf32>
    %394 = arith.addf %393, %392 : vector<8x32xf32>
    %395 = arith.divf %393, %394 : vector<8x32xf32>
    %396 = arith.mulf %387, %331 : vector<8x32xf32>
    %397 = arith.mulf %381, %389 : vector<8x32xf32>
    %398 = arith.addf %396, %397 : vector<8x32xf32>
    %399 = math.tanh %398 : vector<8x32xf32>
    %400 = arith.mulf %395, %399 : vector<8x32xf32>
    %401 = vector.extract_strided_slice %30 {offsets = [48, 0], sizes = [8, 128], strides = [1, 1]} : vector<64x128xf32> to vector<8x128xf32>
    %402 = arith.truncf %400 : vector<8x32xf32> to vector<8x32xbf16>
    %cst_79 = arith.constant dense<0.000000e+00> : vector<8x128xf32>
    %403 = tpu.matmul %402, %31, %cst_79 {dimension_numbers = #tpu.dot_dimension_numbers<[1], [0], [0], [1], [0, 0, 1, 1], [], []>} : vector<8x32xbf16>, vector<32x128xbf16>, vector<8x128xf32> -> vector<8x128xf32>
    %404 = arith.addf %401, %403 : vector<8x128xf32>
    %405 = arith.truncf %400 : vector<8x32xf32> to vector<8x32xbf16>
    %cst_80 = arith.constant dense<0.000000e+00> : vector<8x128xf32>
    %406 = tpu.matmul %405, %32, %cst_80 {dimension_numbers = #tpu.dot_dimension_numbers<[1], [0], [0], [1], [0, 0, 1, 1], [], []>} : vector<8x32xbf16>, vector<32x128xbf16>, vector<8x128xf32> -> vector<8x128xf32>
    %407 = vector.broadcast %34 : vector<1x128xf32> to vector<8x128xf32>
    %408 = arith.addf %406, %407 : vector<8x128xf32>
    %409 = arith.truncf %369 : vector<8x32xf32> to vector<8x32xbf16>
    %cst_81 = arith.constant dense<0.000000e+00> : vector<8x128xf32>
    %410 = tpu.matmul %409, %33, %cst_81 {dimension_numbers = #tpu.dot_dimension_numbers<[1], [0], [0], [1], [0, 0, 1, 1], [], []>} : vector<8x32xbf16>, vector<32x128xbf16>, vector<8x128xf32> -> vector<8x128xf32>
    %411 = arith.addf %408, %410 : vector<8x128xf32>
    %412 = vector.extract_strided_slice %411 {offsets = [0, 0], sizes = [8, 32], strides = [1, 1]} : vector<8x128xf32> to vector<8x32xf32>
    %413 = arith.negf %412 : vector<8x32xf32>
    %414 = math.exp %413 : vector<8x32xf32>
    %cst_82 = arith.constant 1.000000e+00 : f32
    %415 = vector.broadcast %cst_82 : f32 to vector<8x32xf32>
    %416 = arith.addf %415, %414 : vector<8x32xf32>
    %417 = arith.divf %415, %416 : vector<8x32xf32>
    %418 = vector.extract_strided_slice %411 {offsets = [0, 32], sizes = [8, 32], strides = [1, 1]} : vector<8x128xf32> to vector<8x32xf32>
    %419 = arith.negf %418 : vector<8x32xf32>
    %420 = math.exp %419 : vector<8x32xf32>
    %cst_83 = arith.constant 1.000000e+00 : f32
    %421 = vector.broadcast %cst_83 : f32 to vector<8x32xf32>
    %422 = arith.addf %421, %420 : vector<8x32xf32>
    %423 = arith.divf %421, %422 : vector<8x32xf32>
    %424 = vector.extract_strided_slice %411 {offsets = [0, 64], sizes = [8, 32], strides = [1, 1]} : vector<8x128xf32> to vector<8x32xf32>
    %425 = math.tanh %424 : vector<8x32xf32>
    %426 = vector.extract_strided_slice %411 {offsets = [0, 96], sizes = [8, 32], strides = [1, 1]} : vector<8x128xf32> to vector<8x32xf32>
    %427 = arith.negf %426 : vector<8x32xf32>
    %428 = math.exp %427 : vector<8x32xf32>
    %cst_84 = arith.constant 1.000000e+00 : f32
    %429 = vector.broadcast %cst_84 : f32 to vector<8x32xf32>
    %430 = arith.addf %429, %428 : vector<8x32xf32>
    %431 = arith.divf %429, %430 : vector<8x32xf32>
    %432 = arith.mulf %423, %367 : vector<8x32xf32>
    %433 = arith.mulf %417, %425 : vector<8x32xf32>
    %434 = arith.addf %432, %433 : vector<8x32xf32>
    %435 = math.tanh %434 : vector<8x32xf32>
    %436 = arith.mulf %431, %435 : vector<8x32xf32>
    %cst_85 = arith.constant 5.000000e+00 : f32
    %437 = vector.broadcast %cst_85 : f32 to vector<8x1xf32>
    %438 = arith.cmpf ogt, %35, %437 : vector<8x1xf32>
    %439 = arith.extui %438 : vector<8x1xi1> to vector<8x1xi32>
    %440 = arith.sitofp %439 : vector<8x1xi32> to vector<8x1xf32>
    %441 = vector.broadcast %440 : vector<8x1xf32> to vector<8x32xf32>
    %442 = arith.mulf %436, %441 : vector<8x32xf32>
    %443 = vector.extract_strided_slice %404 {offsets = [0, 0], sizes = [8, 32], strides = [1, 1]} : vector<8x128xf32> to vector<8x32xf32>
    %444 = arith.negf %443 : vector<8x32xf32>
    %445 = math.exp %444 : vector<8x32xf32>
    %cst_86 = arith.constant 1.000000e+00 : f32
    %446 = vector.broadcast %cst_86 : f32 to vector<8x32xf32>
    %447 = arith.addf %446, %445 : vector<8x32xf32>
    %448 = arith.divf %446, %447 : vector<8x32xf32>
    %449 = vector.extract_strided_slice %404 {offsets = [0, 32], sizes = [8, 32], strides = [1, 1]} : vector<8x128xf32> to vector<8x32xf32>
    %450 = arith.negf %449 : vector<8x32xf32>
    %451 = math.exp %450 : vector<8x32xf32>
    %cst_87 = arith.constant 1.000000e+00 : f32
    %452 = vector.broadcast %cst_87 : f32 to vector<8x32xf32>
    %453 = arith.addf %452, %451 : vector<8x32xf32>
    %454 = arith.divf %452, %453 : vector<8x32xf32>
    %455 = vector.extract_strided_slice %404 {offsets = [0, 64], sizes = [8, 32], strides = [1, 1]} : vector<8x128xf32> to vector<8x32xf32>
    %456 = math.tanh %455 : vector<8x32xf32>
    %457 = vector.extract_strided_slice %404 {offsets = [0, 96], sizes = [8, 32], strides = [1, 1]} : vector<8x128xf32> to vector<8x32xf32>
    %458 = arith.negf %457 : vector<8x32xf32>
    %459 = math.exp %458 : vector<8x32xf32>
    %cst_88 = arith.constant 1.000000e+00 : f32
    %460 = vector.broadcast %cst_88 : f32 to vector<8x32xf32>
    %461 = arith.addf %460, %459 : vector<8x32xf32>
    %462 = arith.divf %460, %461 : vector<8x32xf32>
    %463 = arith.mulf %454, %398 : vector<8x32xf32>
    %464 = arith.mulf %448, %456 : vector<8x32xf32>
    %465 = arith.addf %463, %464 : vector<8x32xf32>
    %466 = math.tanh %465 : vector<8x32xf32>
    %467 = arith.mulf %462, %466 : vector<8x32xf32>
    %468 = vector.extract_strided_slice %30 {offsets = [56, 0], sizes = [8, 128], strides = [1, 1]} : vector<64x128xf32> to vector<8x128xf32>
    %469 = arith.truncf %467 : vector<8x32xf32> to vector<8x32xbf16>
    %cst_89 = arith.constant dense<0.000000e+00> : vector<8x128xf32>
    %470 = tpu.matmul %469, %31, %cst_89 {dimension_numbers = #tpu.dot_dimension_numbers<[1], [0], [0], [1], [0, 0, 1, 1], [], []>} : vector<8x32xbf16>, vector<32x128xbf16>, vector<8x128xf32> -> vector<8x128xf32>
    %471 = arith.addf %468, %470 : vector<8x128xf32>
    %472 = arith.truncf %467 : vector<8x32xf32> to vector<8x32xbf16>
    %cst_90 = arith.constant dense<0.000000e+00> : vector<8x128xf32>
    %473 = tpu.matmul %472, %32, %cst_90 {dimension_numbers = #tpu.dot_dimension_numbers<[1], [0], [0], [1], [0, 0, 1, 1], [], []>} : vector<8x32xbf16>, vector<32x128xbf16>, vector<8x128xf32> -> vector<8x128xf32>
    %474 = vector.broadcast %34 : vector<1x128xf32> to vector<8x128xf32>
    %475 = arith.addf %473, %474 : vector<8x128xf32>
    %476 = arith.truncf %436 : vector<8x32xf32> to vector<8x32xbf16>
    %cst_91 = arith.constant dense<0.000000e+00> : vector<8x128xf32>
    %477 = tpu.matmul %476, %33, %cst_91 {dimension_numbers = #tpu.dot_dimension_numbers<[1], [0], [0], [1], [0, 0, 1, 1], [], []>} : vector<8x32xbf16>, vector<32x128xbf16>, vector<8x128xf32> -> vector<8x128xf32>
    %478 = arith.addf %475, %477 : vector<8x128xf32>
    %479 = vector.extract_strided_slice %478 {offsets = [0, 0], sizes = [8, 32], strides = [1, 1]} : vector<8x128xf32> to vector<8x32xf32>
    %480 = arith.negf %479 : vector<8x32xf32>
    %481 = math.exp %480 : vector<8x32xf32>
    %cst_92 = arith.constant 1.000000e+00 : f32
    %482 = vector.broadcast %cst_92 : f32 to vector<8x32xf32>
    %483 = arith.addf %482, %481 : vector<8x32xf32>
    %484 = arith.divf %482, %483 : vector<8x32xf32>
    %485 = vector.extract_strided_slice %478 {offsets = [0, 32], sizes = [8, 32], strides = [1, 1]} : vector<8x128xf32> to vector<8x32xf32>
    %486 = arith.negf %485 : vector<8x32xf32>
    %487 = math.exp %486 : vector<8x32xf32>
    %cst_93 = arith.constant 1.000000e+00 : f32
    %488 = vector.broadcast %cst_93 : f32 to vector<8x32xf32>
    %489 = arith.addf %488, %487 : vector<8x32xf32>
    %490 = arith.divf %488, %489 : vector<8x32xf32>
    %491 = vector.extract_strided_slice %478 {offsets = [0, 64], sizes = [8, 32], strides = [1, 1]} : vector<8x128xf32> to vector<8x32xf32>
    %492 = math.tanh %491 : vector<8x32xf32>
    %493 = vector.extract_strided_slice %478 {offsets = [0, 96], sizes = [8, 32], strides = [1, 1]} : vector<8x128xf32> to vector<8x32xf32>
    %494 = arith.negf %493 : vector<8x32xf32>
    %495 = math.exp %494 : vector<8x32xf32>
    %cst_94 = arith.constant 1.000000e+00 : f32
    %496 = vector.broadcast %cst_94 : f32 to vector<8x32xf32>
    %497 = arith.addf %496, %495 : vector<8x32xf32>
    %498 = arith.divf %496, %497 : vector<8x32xf32>
    %499 = arith.mulf %490, %434 : vector<8x32xf32>
    %500 = arith.mulf %484, %492 : vector<8x32xf32>
    %501 = arith.addf %499, %500 : vector<8x32xf32>
    %502 = math.tanh %501 : vector<8x32xf32>
    %503 = arith.mulf %498, %502 : vector<8x32xf32>
    %cst_95 = arith.constant 6.000000e+00 : f32
    %504 = vector.broadcast %cst_95 : f32 to vector<8x1xf32>
    %505 = arith.cmpf ogt, %35, %504 : vector<8x1xf32>
    %506 = arith.extui %505 : vector<8x1xi1> to vector<8x1xi32>
    %507 = arith.sitofp %506 : vector<8x1xi32> to vector<8x1xf32>
    %508 = vector.broadcast %507 : vector<8x1xf32> to vector<8x32xf32>
    %509 = arith.mulf %503, %508 : vector<8x32xf32>
    %510 = vector.extract_strided_slice %471 {offsets = [0, 0], sizes = [8, 32], strides = [1, 1]} : vector<8x128xf32> to vector<8x32xf32>
    %511 = arith.negf %510 : vector<8x32xf32>
    %512 = math.exp %511 : vector<8x32xf32>
    %cst_96 = arith.constant 1.000000e+00 : f32
    %513 = vector.broadcast %cst_96 : f32 to vector<8x32xf32>
    %514 = arith.addf %513, %512 : vector<8x32xf32>
    %515 = arith.divf %513, %514 : vector<8x32xf32>
    %516 = vector.extract_strided_slice %471 {offsets = [0, 32], sizes = [8, 32], strides = [1, 1]} : vector<8x128xf32> to vector<8x32xf32>
    %517 = arith.negf %516 : vector<8x32xf32>
    %518 = math.exp %517 : vector<8x32xf32>
    %cst_97 = arith.constant 1.000000e+00 : f32
    %519 = vector.broadcast %cst_97 : f32 to vector<8x32xf32>
    %520 = arith.addf %519, %518 : vector<8x32xf32>
    %521 = arith.divf %519, %520 : vector<8x32xf32>
    %522 = vector.extract_strided_slice %471 {offsets = [0, 64], sizes = [8, 32], strides = [1, 1]} : vector<8x128xf32> to vector<8x32xf32>
    %523 = math.tanh %522 : vector<8x32xf32>
    %524 = vector.extract_strided_slice %471 {offsets = [0, 96], sizes = [8, 32], strides = [1, 1]} : vector<8x128xf32> to vector<8x32xf32>
    %525 = arith.negf %524 : vector<8x32xf32>
    %526 = math.exp %525 : vector<8x32xf32>
    %cst_98 = arith.constant 1.000000e+00 : f32
    %527 = vector.broadcast %cst_98 : f32 to vector<8x32xf32>
    %528 = arith.addf %527, %526 : vector<8x32xf32>
    %529 = arith.divf %527, %528 : vector<8x32xf32>
    %530 = arith.mulf %521, %465 : vector<8x32xf32>
    %531 = arith.mulf %515, %523 : vector<8x32xf32>
    %532 = arith.addf %530, %531 : vector<8x32xf32>
    %533 = math.tanh %532 : vector<8x32xf32>
    %534 = arith.mulf %529, %533 : vector<8x32xf32>
    %535 = arith.truncf %534 : vector<8x32xf32> to vector<8x32xbf16>
    %cst_99 = arith.constant dense<0.000000e+00> : vector<8x128xf32>
    %536 = tpu.matmul %535, %32, %cst_99 {dimension_numbers = #tpu.dot_dimension_numbers<[1], [0], [0], [1], [0, 0, 1, 1], [], []>} : vector<8x32xbf16>, vector<32x128xbf16>, vector<8x128xf32> -> vector<8x128xf32>
    %537 = vector.broadcast %34 : vector<1x128xf32> to vector<8x128xf32>
    %538 = arith.addf %536, %537 : vector<8x128xf32>
    %539 = arith.truncf %503 : vector<8x32xf32> to vector<8x32xbf16>
    %cst_100 = arith.constant dense<0.000000e+00> : vector<8x128xf32>
    %540 = tpu.matmul %539, %33, %cst_100 {dimension_numbers = #tpu.dot_dimension_numbers<[1], [0], [0], [1], [0, 0, 1, 1], [], []>} : vector<8x32xbf16>, vector<32x128xbf16>, vector<8x128xf32> -> vector<8x128xf32>
    %541 = arith.addf %538, %540 : vector<8x128xf32>
    %542 = vector.extract_strided_slice %541 {offsets = [0, 0], sizes = [8, 32], strides = [1, 1]} : vector<8x128xf32> to vector<8x32xf32>
    %543 = arith.negf %542 : vector<8x32xf32>
    %544 = math.exp %543 : vector<8x32xf32>
    %cst_101 = arith.constant 1.000000e+00 : f32
    %545 = vector.broadcast %cst_101 : f32 to vector<8x32xf32>
    %546 = arith.addf %545, %544 : vector<8x32xf32>
    %547 = arith.divf %545, %546 : vector<8x32xf32>
    %548 = vector.extract_strided_slice %541 {offsets = [0, 32], sizes = [8, 32], strides = [1, 1]} : vector<8x128xf32> to vector<8x32xf32>
    %549 = arith.negf %548 : vector<8x32xf32>
    %550 = math.exp %549 : vector<8x32xf32>
    %cst_102 = arith.constant 1.000000e+00 : f32
    %551 = vector.broadcast %cst_102 : f32 to vector<8x32xf32>
    %552 = arith.addf %551, %550 : vector<8x32xf32>
    %553 = arith.divf %551, %552 : vector<8x32xf32>
    %554 = vector.extract_strided_slice %541 {offsets = [0, 64], sizes = [8, 32], strides = [1, 1]} : vector<8x128xf32> to vector<8x32xf32>
    %555 = math.tanh %554 : vector<8x32xf32>
    %556 = vector.extract_strided_slice %541 {offsets = [0, 96], sizes = [8, 32], strides = [1, 1]} : vector<8x128xf32> to vector<8x32xf32>
    %557 = arith.negf %556 : vector<8x32xf32>
    %558 = math.exp %557 : vector<8x32xf32>
    %cst_103 = arith.constant 1.000000e+00 : f32
    %559 = vector.broadcast %cst_103 : f32 to vector<8x32xf32>
    %560 = arith.addf %559, %558 : vector<8x32xf32>
    %561 = arith.divf %559, %560 : vector<8x32xf32>
    %562 = arith.mulf %553, %501 : vector<8x32xf32>
    %563 = arith.mulf %547, %555 : vector<8x32xf32>
    %564 = arith.addf %562, %563 : vector<8x32xf32>
    %565 = math.tanh %564 : vector<8x32xf32>
    %566 = arith.mulf %561, %565 : vector<8x32xf32>
    %cst_104 = arith.constant 7.000000e+00 : f32
    %567 = vector.broadcast %cst_104 : f32 to vector<8x1xf32>
    %568 = arith.cmpf ogt, %35, %567 : vector<8x1xf32>
    %569 = arith.extui %568 : vector<8x1xi1> to vector<8x1xi32>
    %570 = arith.sitofp %569 : vector<8x1xi32> to vector<8x1xf32>
    %571 = vector.broadcast %570 : vector<8x1xf32> to vector<8x32xf32>
    %572 = arith.mulf %566, %571 : vector<8x32xf32>
    %573 = tpu.concatenate %107, %174, %241, %308, %375, %442, %509, %572 in 0 : vector<8x32xf32>, vector<8x32xf32>, vector<8x32xf32>, vector<8x32xf32>, vector<8x32xf32>, vector<8x32xf32>, vector<8x32xf32>, vector<8x32xf32> -> vector<64x32xf32>
    %574 = arith.truncf %573 : vector<64x32xf32> to vector<64x32xbf16>
    %c0_105 = arith.constant 0 : index
    %c0_106 = arith.constant 0 : index
    %575 = vector.load %arg11[%c0_105, %c0_106] : memref<32x16xbf16, #tpu.memory_space<vmem>>, vector<32x16xbf16>
    %cst_107 = arith.constant dense<0.000000e+00> : vector<64x16xf32>
    %576 = tpu.matmul %574, %575, %cst_107 {dimension_numbers = #tpu.dot_dimension_numbers<[1], [0], [0], [1], [0, 0, 1, 1], [], []>} : vector<64x32xbf16>, vector<32x16xbf16>, vector<64x16xf32> -> vector<64x16xf32>
    %c0_108 = arith.constant 0 : index
    %c0_109 = arith.constant 0 : index
    %577 = vector.load %arg12[%c0_108, %c0_109] : memref<1x16xf32, #tpu.memory_space<vmem>>, vector<1x16xf32>
    %578 = vector.broadcast %577 : vector<1x16xf32> to vector<64x16xf32>
    %579 = arith.addf %576, %578 : vector<64x16xf32>
    %cst_110 = arith.constant 0.000000e+00 : f32
    %580 = vector.broadcast %cst_110 : f32 to vector<64x16xf32>
    %581 = arith.maximumf %579, %580 : vector<64x16xf32>
    %582 = arith.truncf %581 : vector<64x16xf32> to vector<64x16xbf16>
    %c0_111 = arith.constant 0 : index
    %c0_112 = arith.constant 0 : index
    %583 = vector.load %arg13[%c0_111, %c0_112] : memref<16x1xbf16, #tpu.memory_space<vmem>>, vector<16x1xbf16>
    %cst_113 = arith.constant dense<0.000000e+00> : vector<64x1xf32>
    %584 = tpu.matmul %582, %583, %cst_113 {dimension_numbers = #tpu.dot_dimension_numbers<[1], [0], [0], [1], [0, 0, 1, 1], [], []>} : vector<64x16xbf16>, vector<16x1xbf16>, vector<64x1xf32> -> vector<64x1xf32>
    %c0_114 = arith.constant 0 : index
    %c0_115 = arith.constant 0 : index
    %585 = vector.load %arg14[%c0_114, %c0_115] : memref<1x1xf32, #tpu.memory_space<vmem>>, vector<1x1xf32>
    %586 = vector.broadcast %585 : vector<1x1xf32> to vector<64x1xf32>
    %587 = arith.addf %584, %586 : vector<64x1xf32>
    %588 = arith.negf %587 : vector<64x1xf32>
    %589 = math.exp %588 : vector<64x1xf32>
    %cst_116 = arith.constant 1.000000e+00 : f32
    %590 = vector.broadcast %cst_116 : f32 to vector<64x1xf32>
    %591 = arith.addf %590, %589 : vector<64x1xf32>
    %592 = arith.divf %590, %591 : vector<64x1xf32>
    %c0_117 = arith.constant 0 : index
    %c0_118 = arith.constant 0 : index
    %593 = vector.load %arg15[%c0_117, %c0_118] : memref<64x1xf32, #tpu.memory_space<vmem>>, vector<64x1xf32>
    tpu.vector_store %arg15[%c0_117, %c0_118], %592 {strides = array<i32>} : memref<64x1xf32, #tpu.memory_space<vmem>>, vector<64x1xf32>,
    return
  }
  func.func @transform_0(%arg0: i32) -> (i32, i32) {
    %c0_i32 = arith.constant 0 : i32
    %c0_i32_0 = arith.constant 0 : i32
    %c0_i32_1 = arith.constant 0 : i32
    return %c0_i32, %c0_i32_0 : i32, i32
  }
  func.func @transform_1(%arg0: i32) -> (i32, i32) {
    %c0_i32 = arith.constant 0 : i32
    %c0_i32_0 = arith.constant 0 : i32
    %c0_i32_1 = arith.constant 0 : i32
    return %c0_i32, %c0_i32_0 : i32, i32
  }
  func.func @transform_2(%arg0: i32) -> (i32, i32) {
    %c0_i32 = arith.constant 0 : i32
    %c0_i32_0 = arith.constant 0 : i32
    %c0_i32_1 = arith.constant 0 : i32
    return %c0_i32, %c0_i32_0 : i32, i32
  }
  func.func @transform_3(%arg0: i32) -> (i32, i32) {
    %c0_i32 = arith.constant 0 : i32
    %c0_i32_0 = arith.constant 0 : i32
    %c0_i32_1 = arith.constant 0 : i32
    return %c0_i32, %c0_i32_0 : i32, i32
  }
  func.func @transform_4(%arg0: i32) -> (i32, i32) {
    %c0_i32 = arith.constant 0 : i32
    %c0_i32_0 = arith.constant 0 : i32
    %c0_i32_1 = arith.constant 0 : i32
    return %c0_i32, %c0_i32_0 : i32, i32
  }
  func.func @transform_5(%arg0: i32) -> (i32, i32) {
    %c0_i32 = arith.constant 0 : i32
    %c0_i32_0 = arith.constant 0 : i32
    %c0_i32_1 = arith.constant 0 : i32
    return %c0_i32, %c0_i32_0 : i32, i32
  }
  func.func @transform_6(%arg0: i32) -> (i32, i32) {
    %c0_i32 = arith.constant 0 : i32
    %c0_i32_0 = arith.constant 0 : i32
    %c0_i32_1 = arith.constant 0 : i32
    return %c0_i32, %c0_i32_0 : i32, i32
  }
  func.func @transform_7(%arg0: i32) -> (i32, i32) {
    %c0_i32 = arith.constant 0 : i32
    %c0_i32_0 = arith.constant 0 : i32
    %c0_i32_1 = arith.constant 0 : i32
    return %c0_i32, %c0_i32_0 : i32, i32
  }
  func.func @transform_8(%arg0: i32) -> (i32, i32) {
    %c0_i32 = arith.constant 0 : i32
    %c0_i32_0 = arith.constant 0 : i32
    %c0_i32_1 = arith.constant 0 : i32
    return %c0_i32, %c0_i32_0 : i32, i32
  }
  func.func @transform_9(%arg0: i32) -> (i32, i32) {
    %c0_i32 = arith.constant 0 : i32
    %c0_i32_0 = arith.constant 0 : i32
    %c0_i32_1 = arith.constant 0 : i32
    return %c0_i32, %c0_i32_0 : i32, i32
  }
  func.func @transform_10(%arg0: i32) -> (i32, i32) {
    %c0_i32 = arith.constant 0 : i32
    %c0_i32_0 = arith.constant 0 : i32
    %c0_i32_1 = arith.constant 0 : i32
    return %c0_i32, %c0_i32_0 : i32, i32
  }
  func.func @transform_11(%arg0: i32) -> (i32, i32) {
    %c0_i32 = arith.constant 0 : i32
    %c0_i32_0 = arith.constant 0 : i32
    %c0_i32_1 = arith.constant 0 : i32
    return %c0_i32, %c0_i32_0 : i32, i32
  }
  func.func @transform_12(%arg0: i32) -> (i32, i32) {
    %c0_i32 = arith.constant 0 : i32
    %c0_i32_0 = arith.constant 0 : i32
    %c0_i32_1 = arith.constant 0 : i32
    return %c0_i32, %c0_i32_0 : i32, i32
  }
  func.func @transform_13(%arg0: i32) -> (i32, i32) {
    %c0_i32 = arith.constant 0 : i32
    %c0_i32_0 = arith.constant 0 : i32
    %c0_i32_1 = arith.constant 0 : i32
    return %c0_i32, %c0_i32_0 : i32, i32
  }
  func.func @transform_14(%arg0: i32) -> (i32, i32) {
    %c0_i32 = arith.constant 0 : i32
    %c0_i32_0 = arith.constant 0 : i32
    %c0_i32_1 = arith.constant 0 : i32
    return %c0_i32, %c0_i32_0 : i32, i32
  }
}

</mosaic_0001>

<bundles_post_ra>
// kernel: tpu_custom_call.1
= control target key start
LH: loop header
LB: loop body
LE: loop exit
PB: predicated region body
PF: predicated region fallthrough
CT: control target
= control target key end

     0   :  { %vm58_vm0 = vcmask 130048   ;;  %v2819_v29 = vmov 0.0   ;;  %vm2820_vm1 = vmmov 0   ;;  %v2821_v32 = vmov 0   ;;  %s2822_s16 = smov 64   ;;  %s2823_s21 = smov 32   ;;  %s3474_s0 = inlined_call_operand.vmem [shape: f32[64,16], index: 0, kind: input, shape index: {}]   ;;  %s3475_s6 = inlined_call_operand.vmem [shape: bf16[32,128], index: 6, kind: input, shape index: {}]   ;;  %s3476_s4 = inlined_call_operand.vmem [shape: bf16[16,128], index: 4, kind: input, shape index: {}]   ;;  %s3477_s2 = inlined_call_operand.vmem [shape: f32[1,16], index: 2, kind: input, shape index: {}]   ;;  %s3478_s3 = inlined_call_operand.vmem [shape: f32[1,16], index: 3, kind: input, shape index: {}]   ;;  %s3479_s5 = inlined_call_operand.vmem [shape: f32[1,128], index: 5, kind: input, shape index: {}]   ;;  %s3480_s7 = inlined_call_operand.vmem [shape: bf16[32,128], index: 7, kind: input, shape index: {}]   ;;  %s3481_s9 = inlined_call_operand.vmem [shape: bf16[32,128], index: 9, kind: input, shape index: {}]   ;;  %s3482_s8 = inlined_call_operand.vmem [shape: f32[1,128], index: 8, kind: input, shape index: {}]   ;;  %s3483_s1 = inlined_call_operand.vmem [shape: f32[8,1], index: 1, kind: input, shape index: {}]   ;;  %s3484_s10 = inlined_call_operand.vmem [shape: bf16[32,16], index: 10, kind: input, shape index: {}]   ;;  %s3485_s12 = inlined_call_operand.vmem [shape: bf16[16,1], index: 12, kind: input, shape index: {}]   ;;  %s3486_s13 = inlined_call_operand.<no memory space> [shape: f32[1,1], index: 13, kind: input, shape index: {}]   ;;  %s3487_s11 = inlined_call_operand.vmem [shape: f32[1,16], index: 11, kind: input, shape index: {}]   ;;  %s3488_s14 = inlined_call_operand.vmem [shape: f32[64,1], index: 14, kind: output, shape index: {}]  }
   0x1   :  { %v50_v0 = vld [vmem:[%s3474_s0] sm:$0xff]  ;;  %v52_v1 = vld [vmem:[%s3474_s0 + $0x10] sm:$0xff]  ;;  %v51_v2 = vld [vmem:[%s3474_s0 + $0x8] sm:$0xff]  ;;  %2348 = vmatprep.subr.bf16.mxu1 %v2819_v29  ;;  %2352 = vmatprep.mubr.msk.bf16.mxu1 %vm2820_vm1, %v2819_v29  ;;  %vm316_vm2 = vcmask 261120   ;;  %vm2155_vm11 = vcmask 7168  }
   0x2   :  { %v59_v3 = vsel %vm58_vm0, %v50_v0, 0.0  ;;  %v65_v4 = vsel %vm58_vm0, %v52_v1, 0.0  ;;  %v53_v5 = vld [vmem:[%s3474_s0 + $0x18] sm:$0xff]  ;;  %v62_v6 = vsel %vm58_vm0, %v51_v2, 0.0  ;;  %v2934_v28 = vld [vmem:[%s3475_s6] sm:$0xff]   ;;  %v2945_v31 = vld [vmem:[%s3475_s6 + $0x8] sm:$0xff]   ;;  %2607 = vset.pattern.permute.xlu0 %v2821_v32  ;;  %2613 = vset.pattern.permute.xlu1 %v2821_v32 }
   0x3   :  { %60 = vadd.xlane.f32.xlu0 %v59_v3  ;;  %66 = vadd.xlane.f32.xlu1 %v65_v4  ;;  %v68_v7 = vsel %vm58_vm0, %v53_v5, 0.0  ;;  %v2630_v30 = vld [vmem:[%s3476_s4] sm:$0xff]  }
   0x4   :  { %2349 = vmatpush3.bf16.msra.mxu1 %v2934_v28  ;;  %2338 = vmatprep.subr.bf16.mxu0 %v2630_v30  ;;  %v2965_v47 = vld [vmem:[%s3477_s2] ss:$0 sm:$0xff] }
   0x5   :  { %2350 = vmatprep.subr.bf16.mxu1 %v2819_v29  ;;  %2339 = vmatpush3.bf16.msra.mxu0 %v2630_v30  ;;  %v2972_v53 = vld [vmem:[%s3478_s3] ss:$0 sm:$0xff]  ;;  %v57_v30 = vld [vmem:[%s3474_s0 + $0x38] sm:$0xff] }
   0x6   :  { %2364 = vmatprep.subr.bf16.mxu0 %v2819_v29 }
   0x7   :  { %63 = vadd.xlane.f32.xlu0 %v62_v6  ;;  %69 = vadd.xlane.f32.xlu1 %v68_v7  ;;  %v2991_v7 = vld [vmem:[%s3479_s5] ss:$0 sm:$0xff] }
   0x8   :  { %2351 = vmatpush3.bf16.msra.mxu1 %v2945_v31 }
   0x9   :  { %2356 = vmatprep.subr.bf16.mxu1 %v2819_v29 }
   0xb   :  { %2353 = vmatmul.mubr.bf16.vlgmr.msra.gmra.mrb[0].mxu1 %v2821_v32 }
   0xc   :  { %2357 = vmatpush3.bf16.msra.mxu1 %v2934_v28  ;;  %2360 = vmatprep.mubr.msk.bf16.mxu1 %vm2820_vm1, %v2819_v29 }
   0xd   :  { %2358 = vmatprep.subr.bf16.mxu1 %v2819_v29 }
  0x10   :  { %2359 = vmatpush3.bf16.msra.mxu1 %v2945_v31 }
  0x11   :  { %2380 = vmatprep.subr.bf16.mxu1 %v2819_v29 }
  0x90   :  { %v61_v8 = vpop.xlane.xlu0 %60  ;;  %v67_v9 = vpop.xlane.xlu1 %66 }
  0x91   :  { %v84_v10 = vmul.f32 0.0625, %v61_v8  ;;  %v86_v11 = vmul.f32 0.0625, %v67_v9 }
  0x93   :  { %v2915_v12 = vsub.f32 %v50_v0, %v84_v10  ;;  %v2917_v13 = vsub.f32 %v52_v1, %v86_v11 }
  0x94   :  { %v64_v14 = vpop.xlane.xlu0 %63  ;;  %v70_v15 = vpop.xlane.xlu1 %69 }
  0x95   :  { %v85_v16 = vmul.f32 0.0625, %v64_v14  ;;  %v87_v17 = vmul.f32 0.0625, %v70_v15  ;;  %v100_v18 = vmul.f32 %v2915_v12, %v2915_v12  ;;  %v102_v19 = vmul.f32 %v2917_v13, %v2917_v13  ;;  %v55_v15 = vld [vmem:[%s3474_s0 + $0x28] sm:$0xff] }
  0x97   :  { %v93_v20 = vsub.f32 %v51_v2, %v85_v16  ;;  %v2923_v21 = vsub.f32 %v53_v5, %v87_v17  ;;  %v108_v22 = vsel %vm58_vm0, %v100_v18, 0.0  ;;  %v114_v23 = vsel %vm58_vm0, %v102_v19, 0.0  ;;  %v54_v5 = vld [vmem:[%s3474_s0 + $0x20] sm:$0xff]  ;;  %v56_v17 = vld [vmem:[%s3474_s0 + $0x30] sm:$0xff] }
  0x98   :  { %109 = vadd.xlane.f32.xlu0 %v108_v22  ;;  %v71_v6 = vsel %vm58_vm0, %v54_v5, 0.0  ;;  %v74_v16 = vsel %vm58_vm0, %v55_v15, 0.0  ;;  %v77_v18 = vsel %vm58_vm0, %v56_v17, 0.0 }
  0x99   :  { %v101_v24 = vmul.f32 %v93_v20, %v93_v20  ;;  %v103_v25 = vmul.f32 %v2923_v21, %v2923_v21 }
  0x9b   :  { %v111_v26 = vsel %vm58_vm0, %v101_v24, 0.0  ;;  %v117_v27 = vsel %vm58_vm0, %v103_v25, 0.0 }
  0x9c   :  { %115 = vadd.xlane.f32.xlu0 %v114_v23  ;;  %112 = vadd.xlane.f32.xlu1 %v111_v26 }
  0xa0   :  { %118 = vadd.xlane.f32.xlu1 %v117_v27 }
  0xa4   :  { %72 = vadd.xlane.f32.xlu1 %v71_v6 }
  0xde   :  { %v354_v1 = vpop.f32.mrb[0].mxu1 }
  0xdf   :  { %v2354_v2 = vpop.f32.mrb[1].mxu1 }
  0xe0   :  { %v357_v3 = vpop.f32.mrb[2].mxu1 }
  0xe1   :  { %v2355_v4 = vpop.f32.mrb[3].mxu1 }
 0x125   :  { %v110_v33 = vpop.xlane.xlu0 %109 }
 0x126   :  { %v132_v34 = vmul.f32 0.0625, %v110_v33  ;;  %v80_v33 = vsel %vm58_vm0, %v57_v30, 0.0 }
 0x128   :  { %v140_v35 = vadd.f32 1e-05, %v132_v34 }
 0x129   :  { %v113_v36 = vpop.xlane.xlu1 %112  ;;  %v116_v37 = vpop.xlane.xlu0 %115 }
 0x12a   :  { %2639 = vrsqrt.f32 %v140_v35  ;;  %v133_v38 = vmul.f32 0.0625, %v113_v36  ;;  %v134_v39 = vmul.f32 0.0625, %v116_v37 }
 0x12c   :  { %v141_v40 = vadd.f32 1e-05, %v133_v38  ;;  %v142_v41 = vadd.f32 1e-05, %v134_v39 }
 0x12d   :  { %v119_v42 = vpop.xlane.xlu1 %118 }
 0x12e   :  { %2641 = vrsqrt.f32 %v141_v40  ;;  %v135_v43 = vmul.f32 0.0625, %v119_v42 }
 0x12f   :  { %2643 = vrsqrt.f32 %v142_v41 }
 0x130   :  { %v143_v44 = vadd.f32 1e-05, %v135_v43 }
 0x131   :  { %v73_v25 = vpop.xlane.xlu1 %72 }
 0x132   :  { %2645 = vrsqrt.f32 %v143_v44  ;;  %v88_v26 = vmul.f32 0.0625, %v73_v25 }
 0x134   :  { %v2640_v45 = vpop.eup %2639  ;;  %v96_v27 = vsub.f32 %v54_v5, %v88_v26  ;;  %v3031_v5 = vld [vmem:[%s3480_s7] sm:$0xff]  }
 0x135   :  { %v156_v46 = vmul.f32 %v2640_v45, %v2915_v12 }
 0x136   :  { %v104_v34 = vmul.f32 %v96_v27, %v96_v27 }
 0x137   :  { %v171_v51 = vmul.f32 %v2965_v47, %v156_v46 }
 0x138   :  { %v2642_v48 = vpop.eup %2641  ;;  %v120_v35 = vsel %vm58_vm0, %v104_v34, 0.0 }
 0x139   :  { %v2644_v49 = vpop.eup %2643  ;;  %v157_v50 = vmul.f32 %v2642_v48, %v93_v20  ;;  %v186_v57 = vadd.f32 %v2972_v53, %v171_v51 }
 0x13a   :  { %v158_v52 = vmul.f32 %v2644_v49, %v2917_v13 }
 0x13b   :  { %v172_v54 = vmul.f32 %v2965_v47, %v157_v50 }
 0x13c   :  { %v2646_v55 = vpop.eup %2645  ;;  %v173_v59 = vmul.f32 %v2965_v47, %v158_v52 }
 0x13d   :  { %v159_v56 = vmul.f32 %v2646_v55, %v2923_v21  ;;  %v187_v58 = vadd.f32 %v2972_v53, %v172_v54 }
 0x13e   :  { %v188_v62 = vadd.f32 %v2972_v53, %v173_v59 }
 0x13f   :  { %v194_v60 = vpack.c.bf16 %v187_v58, %v186_v57  ;;  %v174_v61 = vmul.f32 %v2965_v47, %v159_v56 }
 0x141   :  { %2340 = vmatprep.mubr.msk.bf16.mxu0 %vm58_vm0, %v194_v60  ;;  %v189_v63 = vadd.f32 %v2972_v53, %v174_v61 }
 0x143   :  { %v195_v0 = vpack.c.bf16 %v189_v63, %v188_v62 }
 0x145   :  { %2341 = vmatmul.mubr.msk.bf16.vlgmr.msra.gmra.mrb[0].mxu0 %vm58_vm0, %v195_v0 }
 0x146   :  { %2365 = vmatpush3.bf16.msra.mxu0 %v3031_v5 }
 0x147   :  { %2366 = vmatprep.subr.bf16.mxu0 %v2819_v29 }
 0x218   :  { %v2993_v8 = vpop.f32.mrb[0].mxu0 }
 0x219   :  { %v259_v9 = vpop.f32.mrb[1].mxu0 }
 0x21a   :  { %v260_v10 = vadd.f32 %v2991_v7, %v259_v9  ;;  %v2996_v11 = vpop.f32.mrb[2].mxu0 }
 0x21b   :  { %v2998_v12 = vpop.f32.mrb[3].mxu0 }
 0x21c   :  { %v360_v13 = vadd.f32 %v354_v1, %v260_v10  ;;  %v3039_v10 = vld [vmem:[%s3480_s7 + $0x8] sm:$0xff]  }
 0x21d   :  { %2367 = vmatpush3.bf16.msra.mxu0 %v3039_v10 }
 0x21e   :  { %2647 = vtanh.f32 %v360_v13  ;;  %v2178_v19 = vmul.f32 -1.442695, %v360_v13  ;;  %2372 = vmatprep.subr.bf16.mxu0 %v2819_v29 }
 0x220   :  { %2649 = vpow2.f32 %v2178_v19 }
 0x228   :  { %v2648_v14 = vpop.eup %2647 }
 0x229   :  { %370 = vrot.lane.b32.xlu0 %v2648_v14, %s2822_s16 }
 0x22a   :  { %v2650_v20 = vpop.eup %2649 }
 0x22b   :  { %v364_v21 = vadd.f32 1.0, %v2650_v20 }
 0x22d   :  { %2651 = vrcp.f32 %v364_v21 }
 0x237   :  { %v3009_v22 = vpop.eup %2651 }
 0x238   :  { %v368_v46 = vmul.f32 0.0, %v3009_v22 }
 0x248   :  { %75 = vadd.xlane.f32.xlu0 %v74_v16 }
 0x24c   :  { %78 = vadd.xlane.f32.xlu0 %v77_v18 }
 0x29b   :  { %v371_v23 = vpop.permute.xlu0 %370 }
 0x29c   :  { %v373_v24 = vmul.f32 %v3009_v22, %v371_v23 }
 0x29e   :  { %375 = vrot.lane.b32.xlu1 %v373_v24, %s2823_s21 }
 0x2c2   :  { %81 = vadd.xlane.f32.xlu1 %v80_v33 }
 0x2c6   :  { %121 = vadd.xlane.f32.xlu1 %v120_v35 }
 0x2d5   :  { %v76_v36 = vpop.xlane.xlu0 %75 }
 0x2d6   :  { %v89_v37 = vmul.f32 0.0625, %v76_v36  ;;  %v3057_v36 = vld [vmem:[%s3481_s9] sm:$0xff]  }
 0x2d8   :  { %v97_v38 = vsub.f32 %v55_v15, %v89_v37 }
 0x2d9   :  { %v79_v39 = vpop.xlane.xlu0 %78 }
 0x2da   :  { %v90_v40 = vmul.f32 0.0625, %v79_v39  ;;  %v105_v41 = vmul.f32 %v97_v38, %v97_v38 }
 0x2dc   :  { %v98_v42 = vsub.f32 %v56_v17, %v90_v40  ;;  %v123_v43 = vsel %vm58_vm0, %v105_v41, 0.0 }
 0x2dd   :  { %124 = vadd.xlane.f32.xlu1 %v123_v43 }
 0x2de   :  { %v106_v44 = vmul.f32 %v98_v42, %v98_v42 }
 0x2e0   :  { %v126_v45 = vsel %vm58_vm0, %v106_v44, 0.0 }
 0x2e1   :  { %127 = vadd.xlane.f32.xlu1 %v126_v45 }
 0x310   :  { %v376_v48 = vpop.permute.xlu1 %375 }
 0x311   :  { %v3021_v49 = vadd.f32 %v376_v48, %v368_v46  ;;  %v3098_v46 = vld [vmem:[%s3482_s8] ss:$0 sm:$0xff] }
 0x313   :  { %2653 = vtanh.f32 %v3021_v49 }
 0x31d   :  { %v2654_v50 = vpop.eup %2653 }
 0x31e   :  { %381 = vrot.lane.b32.xlu0 %v2654_v50, %s2822_s16 }
 0x34f   :  { %v82_v51 = vpop.xlane.xlu1 %81 }
 0x350   :  { %v91_v52 = vmul.f32 0.0625, %v82_v51 }
 0x352   :  { %v99_v54 = vsub.f32 %v57_v30, %v91_v52 }
 0x353   :  { %v122_v57 = vpop.xlane.xlu1 %121 }
 0x354   :  { %v107_v55 = vmul.f32 %v99_v54, %v99_v54  ;;  %v136_v58 = vmul.f32 0.0625, %v122_v57 }
 0x356   :  { %v129_v56 = vsel %vm58_vm0, %v107_v55, 0.0  ;;  %v144_v59 = vadd.f32 1e-05, %v136_v58 }
 0x357   :  { %130 = vadd.xlane.f32.xlu1 %v129_v56 }
 0x358   :  { %2655 = vrsqrt.f32 %v144_v59 }
 0x362   :  { %v2656_v63 = vpop.eup %2655 }
 0x363   :  { %v160_v0 = vmul.f32 %v2656_v63, %v96_v27 }
 0x365   :  { %v175_v3 = vmul.f32 %v2965_v47, %v160_v0 }
 0x367   :  { %v190_v6 = vadd.f32 %v2972_v53, %v175_v3 }
 0x36a   :  { %v125_v60 = vpop.xlane.xlu1 %124 }
 0x36b   :  { %v137_v61 = vmul.f32 0.0625, %v125_v60 }
 0x36d   :  { %v145_v62 = vadd.f32 1e-05, %v137_v61 }
 0x36e   :  { %v128_v17 = vpop.xlane.xlu1 %127 }
 0x36f   :  { %2657 = vrsqrt.f32 %v145_v62  ;;  %v138_v18 = vmul.f32 0.0625, %v128_v17 }
 0x371   :  { %v146_v19 = vadd.f32 1e-05, %v138_v18 }
 0x373   :  { %2659 = vrsqrt.f32 %v146_v19 }
 0x379   :  { %v2658_v1 = vpop.eup %2657 }
 0x37a   :  { %v161_v2 = vmul.f32 %v2658_v1, %v97_v38 }
 0x37c   :  { %v176_v4 = vmul.f32 %v2965_v47, %v161_v2 }
 0x37d   :  { %v2660_v24 = vpop.eup %2659 }
 0x37e   :  { %v191_v9 = vadd.f32 %v2972_v53, %v176_v4  ;;  %v162_v25 = vmul.f32 %v2660_v24, %v98_v42 }
 0x380   :  { %v196_v13 = vpack.c.bf16 %v191_v9, %v190_v6  ;;  %v177_v30 = vmul.f32 %v2965_v47, %v162_v25 }
 0x382   :  { %2344 = vmatprep.mubr.msk.bf16.mxu0 %vm58_vm0, %v196_v13 }
 0x390   :  { %v382_v14 = vpop.permute.xlu0 %381 }
 0x391   :  { %v384_v15 = vmul.f32 %v3009_v22, %v382_v14  ;;  %v192_v22 = vadd.f32 %v2972_v53, %v177_v30 }
 0x393   :  { %v385_v16 = vpack.c.bf16 %v384_v15, %v384_v15 }
 0x395   :  { %387 = vrot.lane.b32.xlu1 %v385_v16, %s2823_s21 }
 0x3e4   :  { %v131_v20 = vpop.xlane.xlu1 %130 }
 0x3e5   :  { %v139_v21 = vmul.f32 0.0625, %v131_v20 }
 0x3e7   :  { %v147_v23 = vadd.f32 1e-05, %v139_v21 }
 0x3e9   :  { %2661 = vrsqrt.f32 %v147_v23 }
 0x3f3   :  { %v2662_v26 = vpop.eup %2661 }
 0x3f4   :  { %v163_v27 = vmul.f32 %v2662_v26, %v99_v54  ;;  %v268_v26 = vadd.f32 %v2993_v8, %v2991_v7 }
 0x3f6   :  { %v178_v33 = vmul.f32 %v2965_v47, %v163_v27  ;;  %v3065_v47 = vld [vmem:[%s3481_s9 + $0x8] sm:$0xff]  }
 0x3f8   :  { %v193_v34 = vadd.f32 %v2972_v53, %v178_v33 }
 0x3fa   :  { %v197_v35 = vpack.c.bf16 %v193_v34, %v192_v22 }
 0x3fc   :  { %2345 = vmatmul.mubr.msk.bf16.gmra.mrb[4].mxu0 %vm58_vm0, %v197_v35 }
 0x3fd   :  { %2368 = vmatprep.mubr.msk.bf16.mxu0 %vm2820_vm1, %v2819_v29 }
 0x407   :  { %v388_v37 = vpop.permute.xlu1 %387 }
 0x408   :  { %2361 = vmatmul.mubr.msk.bf16.vlgmr.msra.gmra.mrb[4].mxu1 %vm316_vm2, %v388_v37  ;;  %2369 = vmatmul.mubr.msk.bf16.vlgmr.msra.gmra.mrb[8].mxu0 %vm316_vm2, %v388_v37 }
 0x409   :  { %2373 = vmatpush3.bf16.msra.mxu0 %v3057_v36  ;;  %2376 = vmatprep.mubr.msk.bf16.mxu0 %vm2820_vm1, %v2819_v29 }
 0x40a   :  { %2374 = vmatprep.subr.bf16.mxu0 %v2819_v29  ;;  %2381 = vmatpush3.bf16.msra.mxu1 %v2934_v28 }
 0x40b   :  { %2382 = vmatprep.subr.bf16.mxu1 %v2819_v29  ;;  %2384 = vmatprep.mubr.msk.bf16.mxu1 %vm2820_vm1, %v2819_v29 }
 0x40d   :  { %2375 = vmatpush3.bf16.msra.mxu0 %v3065_v47 }
 0x40e   :  { %2383 = vmatpush3.bf16.msra.mxu1 %v2945_v31  ;;  %2404 = vmatprep.subr.bf16.mxu0 %v2819_v29 }
 0x40f   :  { %2388 = vmatprep.subr.bf16.mxu1 %v2819_v29 }
 0x414   :  { %2377 = vmatmul.mubr.bf16.vlgmr.msra.gmra.mrb[8].mxu0 %v2821_v32  ;;  %v263_v32 = vadd.f32 %v2991_v7, %v2998_v12 }
 0x415   :  { %2405 = vmatpush3.bf16.msra.mxu0 %v2934_v28  ;;  %2408 = vmatprep.mubr.msk.bf16.mxu0 %vm2820_vm1, %v2819_v29 }
 0x416   :  { %2406 = vmatprep.subr.bf16.mxu0 %v2819_v29 }
 0x419   :  { %2407 = vmatpush3.bf16.msra.mxu0 %v2945_v31 }
 0x41a   :  { %2412 = vmatprep.subr.bf16.mxu0 %v2819_v29 }
 0x4cf   :  { %v3085_v53 = vpop.f32.mrb[4].mxu0 }
 0x4d0   :  { %v3087_v38 = vpop.f32.mrb[5].mxu0 }
 0x4d1   :  { %v3089_v39 = vpop.f32.mrb[6].mxu0 }
 0x4d2   :  { %v3091_v40 = vpop.f32.mrb[7].mxu0 }
 0x4db   :  { %v426_v41 = vpop.f32.mrb[4].mxu1 }
 0x4dc   :  { %v432_v42 = vadd.f32 %v426_v41, %v263_v32  ;;  %v2362_v43 = vpop.f32.mrb[5].mxu1 }
 0x4dd   :  { %v429_v44 = vpop.f32.mrb[6].mxu1 }
 0x4de   :  { %2663 = vtanh.f32 %v432_v42  ;;  %v2363_v45 = vpop.f32.mrb[7].mxu1  ;;  %v2188_v56 = vmul.f32 -1.442695, %v432_v42 }
 0x4e7   :  { %v537_v48 = vpop.f32.mrb[8].mxu0 }
 0x4e8   :  { %v2664_v50 = vpop.eup %2663  ;;  %v2562_v51 = vadd.f32 %v3098_v46, %v537_v48  ;;  %v2378_v52 = vpop.f32.mrb[9].mxu0 }
 0x4e9   :  { %v540_v54 = vpop.f32.mrb[10].mxu0  ;;  %586 = vrot.lane.b32.xlu0 %v2664_v50, %s2822_s16 }
 0x4ea   :  { %2665 = vtanh.f32 %v2562_v51  ;;  %v2379_v12 = vpop.f32.mrb[11].mxu0  ;;  %v2186_v57 = vmul.f32 -1.442695, %v2562_v51 }
 0x4eb   :  { %2667 = vpow2.f32 %v2188_v56 }
 0x4ec   :  { %2669 = vpow2.f32 %v2186_v57 }
 0x4f4   :  { %v2666_v55 = vpop.eup %2665 }
 0x4f5   :  { %553 = vrot.lane.b32.xlu0 %v2666_v55, %s2822_s16  ;;  %v2668_v58 = vpop.eup %2667 }
 0x4f6   :  { %v580_v59 = vadd.f32 1.0, %v2668_v58  ;;  %v2670_v60 = vpop.eup %2669 }
 0x4f7   :  { %v547_v61 = vadd.f32 1.0, %v2670_v60 }
 0x4f8   :  { %2671 = vrcp.f32 %v580_v59 }
 0x4f9   :  { %2673 = vrcp.f32 %v547_v61 }
 0x502   :  { %v2672_v62 = vpop.eup %2671 }
 0x503   :  { %v2674_v1 = vpop.eup %2673  ;;  %v584_v4 = vmul.f32 %v2672_v62, %v3021_v49 }
 0x504   :  { %v551_v13 = vmul.f32 0.0, %v2674_v1 }
 0x55b   :  { %v587_v63 = vpop.permute.xlu0 %586 }
 0x55c   :  { %v589_v0 = vmul.f32 %v2672_v62, %v587_v63 }
 0x55e   :  { %591 = vrot.lane.b32.xlu0 %v589_v0, %s2823_s21 }
 0x567   :  { %v554_v2 = vpop.permute.xlu0 %553 }
 0x568   :  { %v556_v3 = vmul.f32 %v2674_v1, %v554_v2 }
 0x56a   :  { %558 = vrot.lane.b32.xlu1 %v556_v3, %s2823_s21 }
 0x5d0   :  { %v592_v6 = vpop.permute.xlu0 %591 }
 0x5d1   :  { %v3106_v9 = vadd.f32 %v592_v6, %v584_v4 }
 0x5d3   :  { %2675 = vtanh.f32 %v3106_v9 }
 0x5dc   :  { %v559_v14 = vpop.permute.xlu1 %558 }
 0x5dd   :  { %v2676_v15 = vpop.eup %2675  ;;  %v3109_v16 = vadd.f32 %v559_v14, %v551_v13 }
 0x5de   :  { %597 = vrot.lane.b32.xlu0 %v2676_v15, %s2822_s16 }
 0x5df   :  { %2677 = vtanh.f32 %v3109_v16 }
 0x5e9   :  { %v2678_v17 = vpop.eup %2677 }
 0x5ea   :  { %564 = vrot.lane.b32.xlu1 %v2678_v17, %s2822_s16  ;;  %v271_v17 = vadd.f32 %v2996_v11, %v2991_v7 }
 0x650   :  { %v598_v18 = vpop.permute.xlu0 %597 }
 0x651   :  { %v600_v19 = vmul.f32 %v2672_v62, %v598_v18 }
 0x653   :  { %v601_v49 = vpack.c.bf16 %v600_v19, %v600_v19 }
 0x655   :  { %603 = vrot.lane.b32.xlu0 %v601_v49, %s2823_s21 }
 0x65c   :  { %v565_v20 = vpop.permute.xlu1 %564 }
 0x65d   :  { %v3115_v21 = vmul.f32 %v2674_v1, %v565_v20 }
 0x65f   :  { %v689_v23 = vpack.c.bf16 %v3115_v21, %v3115_v21 }
 0x661   :  { %691 = vrot.lane.b32.xlu1 %v689_v23, %s2823_s21 }
 0x6c7   :  { %v604_v24 = vpop.permute.xlu0 %603 }
 0x6c8   :  { %2385 = vmatmul.mubr.msk.bf16.vlgmr.msra.gmra.mrb[8].mxu1 %vm316_vm2, %v604_v24 }
 0x6c9   :  { %2389 = vmatpush3.bf16.msra.mxu1 %v3031_v5  ;;  %2392 = vmatprep.mubr.msk.bf16.mxu1 %vm2820_vm1, %v2819_v29 }
 0x6ca   :  { %2390 = vmatprep.subr.bf16.mxu1 %v2819_v29 }
 0x6cd   :  { %2391 = vmatpush3.bf16.msra.mxu1 %v3039_v10 }
 0x6ce   :  { %2396 = vmatprep.subr.bf16.mxu1 %v2819_v29 }
 0x6d0   :  { %2393 = vmatmul.mubr.msk.bf16.vlgmr.msra.gmra.mrb[12].mxu1 %vm316_vm2, %v604_v24 }
 0x6d1   :  { %2397 = vmatpush3.bf16.msra.mxu1 %v3057_v36  ;;  %2400 = vmatprep.mubr.msk.bf16.mxu1 %vm2820_vm1, %v2819_v29 }
 0x6d2   :  { %2398 = vmatprep.subr.bf16.mxu1 %v2819_v29 }
 0x6d3   :  { %v692_v25 = vpop.permute.xlu1 %691 }
 0x6d5   :  { %2399 = vmatpush3.bf16.msra.mxu1 %v3065_v47 }
 0x6d6   :  { %2428 = vmatprep.subr.bf16.mxu1 %v2819_v29 }
 0x6dc   :  { %2401 = vmatmul.mubr.msk.bf16.vlgmr.msra.gmra.mrb[12].mxu1 %vm316_vm2, %v692_v25 }
 0x6dd   :  { %2429 = vmatpush3.bf16.msra.mxu1 %v2934_v28  ;;  %2432 = vmatprep.mubr.msk.bf16.mxu1 %vm2820_vm1, %v2819_v29 }
 0x6de   :  { %2430 = vmatprep.subr.bf16.mxu1 %v2819_v29 }
 0x6e1   :  { %2431 = vmatpush3.bf16.msra.mxu1 %v2945_v31 }
 0x6e2   :  { %2436 = vmatprep.subr.bf16.mxu1 %v2819_v29 }
 0x79b   :  { %v642_v27 = vpop.f32.mrb[8].mxu1 }
 0x79c   :  { %v648_v30 = vadd.f32 %v642_v27, %v268_v26  ;;  %v2386_v33 = vpop.f32.mrb[9].mxu1 }
 0x79d   :  { %v645_v22 = vpop.f32.mrb[10].mxu1 }
 0x79e   :  { %2679 = vtanh.f32 %v648_v30  ;;  %v2387_v34 = vpop.f32.mrb[11].mxu1  ;;  %v2194_v8 = vmul.f32 -1.442695, %v648_v30 }
 0x7a8   :  { %v2680_v35 = vpop.eup %2679 }
 0x7a9   :  { %779 = vrot.lane.b32.xlu0 %v2680_v35, %s2822_s16 }
 0x7af   :  { %v730_v37 = vpop.f32.mrb[12].mxu1 }
 0x7b0   :  { %v2563_v32 = vadd.f32 %v3098_v46, %v730_v37  ;;  %v2402_v41 = vpop.f32.mrb[13].mxu1 }
 0x7b1   :  { %v733_v42 = vpop.f32.mrb[14].mxu1 }
 0x7b2   :  { %2681 = vtanh.f32 %v2563_v32  ;;  %v2403_v43 = vpop.f32.mrb[15].mxu1  ;;  %v2192_v50 = vmul.f32 -1.442695, %v2563_v32 }
 0x7b3   :  { %2683 = vpow2.f32 %v2194_v8 }
 0x7bc   :  { %v2682_v44 = vpop.eup %2681 }
 0x7bd   :  { %746 = vrot.lane.b32.xlu1 %v2682_v44, %s2822_s16  ;;  %v2684_v45 = vpop.eup %2683 }
 0x7be   :  { %v773_v48 = vadd.f32 1.0, %v2684_v45 }
 0x7c0   :  { %2685 = vrcp.f32 %v773_v48 }
 0x7c1   :  { %2687 = vpow2.f32 %v2192_v50 }
 0x7ca   :  { %v2686_v51 = vpop.eup %2685 }
 0x7cb   :  { %v2688_v12 = vpop.eup %2687  ;;  %v777_v59 = vmul.f32 %v2686_v51, %v3106_v9 }
 0x7cc   :  { %v740_v55 = vadd.f32 1.0, %v2688_v12 }
 0x7ce   :  { %2689 = vrcp.f32 %v740_v55 }
 0x7d8   :  { %v2690_v56 = vpop.eup %2689 }
 0x7d9   :  { %v744_v63 = vmul.f32 %v2690_v56, %v3109_v16 }
 0x81b   :  { %v780_v52 = vpop.permute.xlu0 %779 }
 0x81c   :  { %v782_v54 = vmul.f32 %v2686_v51, %v780_v52 }
 0x81e   :  { %784 = vrot.lane.b32.xlu0 %v782_v54, %s2823_s21 }
 0x82f   :  { %v747_v57 = vpop.permute.xlu1 %746 }
 0x830   :  { %v749_v58 = vmul.f32 %v2690_v56, %v747_v57 }
 0x832   :  { %751 = vrot.lane.b32.xlu1 %v749_v58, %s2823_s21 }
 0x890   :  { %v785_v60 = vpop.permute.xlu0 %784 }
 0x891   :  { %v3149_v61 = vadd.f32 %v785_v60, %v777_v59 }
 0x893   :  { %2691 = vtanh.f32 %v3149_v61 }
 0x89d   :  { %v2692_v62 = vpop.eup %2691 }
 0x89e   :  { %790 = vrot.lane.b32.xlu0 %v2692_v62, %s2822_s16 }
 0x8a4   :  { %v752_v0 = vpop.permute.xlu1 %751 }
 0x8a5   :  { %v3154_v1 = vadd.f32 %v752_v0, %v744_v63 }
 0x8a7   :  { %2693 = vtanh.f32 %v3154_v1 }
 0x8b1   :  { %v2694_v2 = vpop.eup %2693 }
 0x8b2   :  { %757 = vrot.lane.b32.xlu1 %v2694_v2, %s2822_s16  ;;  %v276_v2 = vadd.f32 %v2991_v7, %v3087_v38 }
 0x910   :  { %v791_v3 = vpop.permute.xlu0 %790 }
 0x911   :  { %v793_v4 = vmul.f32 %v2686_v51, %v791_v3 }
 0x913   :  { %v794_v6 = vpack.c.bf16 %v793_v4, %v793_v4 }
 0x915   :  { %796 = vrot.lane.b32.xlu0 %v794_v6, %s2823_s21 }
 0x924   :  { %v758_v9 = vpop.permute.xlu1 %757 }
 0x925   :  { %v3159_v13 = vmul.f32 %v2690_v56, %v758_v9 }
 0x927   :  { %v882_v14 = vpack.c.bf16 %v3159_v13, %v3159_v13 }
 0x929   :  { %884 = vrot.lane.b32.xlu1 %v882_v14, %s2823_s21 }
 0x987   :  { %v797_v15 = vpop.permute.xlu0 %796 }
 0x988   :  { %2409 = vmatmul.mubr.msk.bf16.vlgmr.msra.gmra.mrb[12].mxu0 %vm316_vm2, %v797_v15 }
 0x989   :  { %2413 = vmatpush3.bf16.msra.mxu0 %v3031_v5  ;;  %2416 = vmatprep.mubr.msk.bf16.mxu0 %vm2820_vm1, %v2819_v29 }
 0x98a   :  { %2414 = vmatprep.subr.bf16.mxu0 %v2819_v29 }
 0x98d   :  { %2415 = vmatpush3.bf16.msra.mxu0 %v3039_v10 }
 0x98e   :  { %2420 = vmatprep.subr.bf16.mxu0 %v2819_v29 }
 0x990   :  { %2417 = vmatmul.mubr.msk.bf16.vlgmr.msra.gmra.mrb[16].mxu0 %vm316_vm2, %v797_v15 }
 0x991   :  { %2421 = vmatpush3.bf16.msra.mxu0 %v3057_v36  ;;  %2424 = vmatprep.mubr.msk.bf16.mxu0 %vm2820_vm1, %v2819_v29 }
 0x992   :  { %2422 = vmatprep.subr.bf16.mxu0 %v2819_v29 }
 0x995   :  { %2423 = vmatpush3.bf16.msra.mxu0 %v3065_v47 }
 0x996   :  { %2452 = vmatprep.subr.bf16.mxu0 %v2819_v29 }
 0x99b   :  { %v885_v16 = vpop.permute.xlu1 %884 }
 0x99c   :  { %2425 = vmatmul.mubr.msk.bf16.vlgmr.msra.gmra.mrb[16].mxu0 %vm316_vm2, %v885_v16 }
 0x99d   :  { %2453 = vmatpush3.bf16.msra.mxu0 %v2934_v28  ;;  %2456 = vmatprep.mubr.msk.bf16.mxu0 %vm2820_vm1, %v2819_v29 }
 0x99e   :  { %2454 = vmatprep.subr.bf16.mxu0 %v2819_v29 }
 0x9a1   :  { %2455 = vmatpush3.bf16.msra.mxu0 %v2945_v31 }
 0x9a2   :  { %2460 = vmatprep.subr.bf16.mxu0 %v2819_v29 }
 0xa5b   :  { %v835_v18 = vpop.f32.mrb[12].mxu0 }
 0xa5c   :  { %v841_v19 = vadd.f32 %v835_v18, %v271_v17  ;;  %v2410_v49 = vpop.f32.mrb[13].mxu0 }
 0xa5d   :  { %v838_v20 = vpop.f32.mrb[14].mxu0 }
 0xa5e   :  { %2695 = vtanh.f32 %v841_v19  ;;  %v2411_v23 = vpop.f32.mrb[15].mxu0  ;;  %v2200_v11 = vmul.f32 -1.442695, %v841_v19 }
 0xa68   :  { %v2696_v24 = vpop.eup %2695 }
 0xa69   :  { %972 = vrot.lane.b32.xlu0 %v2696_v24, %s2822_s16 }
 0xa6f   :  { %v923_v25 = vpop.f32.mrb[16].mxu0 }
 0xa70   :  { %v2564_v26 = vadd.f32 %v3098_v46, %v923_v25  ;;  %v2426_v27 = vpop.f32.mrb[17].mxu0 }
 0xa71   :  { %v926_v30 = vpop.f32.mrb[18].mxu0 }
 0xa72   :  { %2697 = vtanh.f32 %v2564_v26  ;;  %v2427_v33 = vpop.f32.mrb[19].mxu0  ;;  %v2198_v37 = vmul.f32 -1.442695, %v2564_v26 }
 0xa73   :  { %2699 = vpow2.f32 %v2200_v11 }
 0xa7c   :  { %v2698_v22 = vpop.eup %2697 }
 0xa7d   :  { %939 = vrot.lane.b32.xlu1 %v2698_v22, %s2822_s16  ;;  %v2700_v34 = vpop.eup %2699 }
 0xa7e   :  { %v966_v35 = vadd.f32 1.0, %v2700_v34 }
 0xa80   :  { %2701 = vrcp.f32 %v966_v35 }
 0xa81   :  { %2703 = vpow2.f32 %v2198_v37 }
 0xa8a   :  { %v2702_v32 = vpop.eup %2701 }
 0xa8b   :  { %v2704_v43 = vpop.eup %2703  ;;  %v970_v50 = vmul.f32 %v2702_v32, %v3149_v61 }
 0xa8c   :  { %v933_v44 = vadd.f32 1.0, %v2704_v43 }
 0xa8e   :  { %2705 = vrcp.f32 %v933_v44 }
 0xa98   :  { %v2706_v8 = vpop.eup %2705 }
 0xa99   :  { %v937_v12 = vmul.f32 %v2706_v8, %v3154_v1 }
 0xadb   :  { %v973_v41 = vpop.permute.xlu0 %972 }
 0xadc   :  { %v975_v42 = vmul.f32 %v2702_v32, %v973_v41 }
 0xade   :  { %977 = vrot.lane.b32.xlu0 %v975_v42, %s2823_s21 }
 0xaef   :  { %v940_v45 = vpop.permute.xlu1 %939 }
 0xaf0   :  { %v942_v48 = vmul.f32 %v2706_v8, %v940_v45 }
 0xaf2   :  { %944 = vrot.lane.b32.xlu1 %v942_v48, %s2823_s21 }
 0xb50   :  { %v978_v51 = vpop.permute.xlu0 %977 }
 0xb51   :  { %v3193_v52 = vadd.f32 %v978_v51, %v970_v50 }
 0xb53   :  { %2707 = vtanh.f32 %v3193_v52 }
 0xb5d   :  { %v2708_v54 = vpop.eup %2707 }
 0xb5e   :  { %983 = vrot.lane.b32.xlu0 %v2708_v54, %s2822_s16 }
 0xb64   :  { %v945_v55 = vpop.permute.xlu1 %944 }
 0xb65   :  { %v3198_v56 = vadd.f32 %v945_v55, %v937_v12 }
 0xb67   :  { %2709 = vtanh.f32 %v3198_v56 }
 0xb71   :  { %v2710_v57 = vpop.eup %2709 }
 0xb72   :  { %950 = vrot.lane.b32.xlu1 %v2710_v57, %s2822_s16  ;;  %v279_v57 = vadd.f32 %v2991_v7, %v3091_v40 }
 0xbd0   :  { %v984_v58 = vpop.permute.xlu0 %983 }
 0xbd1   :  { %v986_v59 = vmul.f32 %v2702_v32, %v984_v58 }
 0xbd3   :  { %v987_v60 = vpack.c.bf16 %v986_v59, %v986_v59 }
 0xbd5   :  { %989 = vrot.lane.b32.xlu0 %v987_v60, %s2823_s21 }
 0xbe4   :  { %v951_v61 = vpop.permute.xlu1 %950 }
 0xbe5   :  { %v3203_v62 = vmul.f32 %v2706_v8, %v951_v61 }
 0xbe7   :  { %v1075_v63 = vpack.c.bf16 %v3203_v62, %v3203_v62 }
 0xbe9   :  { %1077 = vrot.lane.b32.xlu1 %v1075_v63, %s2823_s21 }
 0xc47   :  { %v990_v0 = vpop.permute.xlu0 %989 }
 0xc48   :  { %2433 = vmatmul.mubr.msk.bf16.vlgmr.msra.gmra.mrb[16].mxu1 %vm316_vm2, %v990_v0 }
 0xc49   :  { %2437 = vmatpush3.bf16.msra.mxu1 %v3031_v5  ;;  %2440 = vmatprep.mubr.msk.bf16.mxu1 %vm2820_vm1, %v2819_v29 }
 0xc4a   :  { %2438 = vmatprep.subr.bf16.mxu1 %v2819_v29 }
 0xc4d   :  { %2439 = vmatpush3.bf16.msra.mxu1 %v3039_v10 }
 0xc4e   :  { %2444 = vmatprep.subr.bf16.mxu1 %v2819_v29 }
 0xc50   :  { %2441 = vmatmul.mubr.msk.bf16.vlgmr.msra.gmra.mrb[20].mxu1 %vm316_vm2, %v990_v0 }
 0xc51   :  { %2445 = vmatpush3.bf16.msra.mxu1 %v3057_v36  ;;  %2448 = vmatprep.mubr.msk.bf16.mxu1 %vm2820_vm1, %v2819_v29 }
 0xc52   :  { %2446 = vmatprep.subr.bf16.mxu1 %v2819_v29 }
 0xc55   :  { %2447 = vmatpush3.bf16.msra.mxu1 %v3065_v47 }
 0xc56   :  { %2476 = vmatprep.subr.bf16.mxu1 %v2819_v29 }
 0xc5b   :  { %v1078_v1 = vpop.permute.xlu1 %1077 }
 0xc5c   :  { %2449 = vmatmul.mubr.msk.bf16.vlgmr.msra.gmra.mrb[20].mxu1 %vm316_vm2, %v1078_v1 }
 0xc5d   :  { %2477 = vmatpush3.bf16.msra.mxu1 %v2934_v28  ;;  %2480 = vmatprep.mubr.msk.bf16.mxu1 %vm2820_vm1, %v2819_v29 }
 0xc5e   :  { %2478 = vmatprep.subr.bf16.mxu1 %v2819_v29 }
 0xc61   :  { %2479 = vmatpush3.bf16.msra.mxu1 %v2945_v31 }
 0xc62   :  { %2484 = vmatprep.subr.bf16.mxu1 %v2819_v29 }
 0xd1b   :  { %v1028_v3 = vpop.f32.mrb[16].mxu1 }
 0xd1c   :  { %v1034_v4 = vadd.f32 %v1028_v3, %v276_v2  ;;  %v2434_v6 = vpop.f32.mrb[17].mxu1 }
 0xd1d   :  { %v1031_v9 = vpop.f32.mrb[18].mxu1 }
 0xd1e   :  { %2711 = vtanh.f32 %v1034_v4  ;;  %v2435_v14 = vpop.f32.mrb[19].mxu1  ;;  %v2206_v38 = vmul.f32 -1.442695, %v1034_v4 }
 0xd28   :  { %v2712_v15 = vpop.eup %2711 }
 0xd29   :  { %1165 = vrot.lane.b32.xlu0 %v2712_v15, %s2822_s16 }
 0xd2f   :  { %v1116_v28 = vpop.f32.mrb[20].mxu1 }
 0xd30   :  { %v2565_v16 = vadd.f32 %v3098_v46, %v1116_v28  ;;  %v2450_v17 = vpop.f32.mrb[21].mxu1 }
 0xd31   :  { %v1119_v18 = vpop.f32.mrb[22].mxu1 }
 0xd32   :  { %2713 = vtanh.f32 %v2565_v16  ;;  %v2451_v19 = vpop.f32.mrb[23].mxu1  ;;  %v2204_v24 = vmul.f32 -1.442695, %v2565_v16 }
 0xd33   :  { %2715 = vpow2.f32 %v2206_v38 }
 0xd3c   :  { %v2714_v49 = vpop.eup %2713 }
 0xd3d   :  { %1132 = vrot.lane.b32.xlu1 %v2714_v49, %s2822_s16  ;;  %v2716_v20 = vpop.eup %2715 }
 0xd3e   :  { %v1159_v23 = vadd.f32 1.0, %v2716_v20 }
 0xd40   :  { %2717 = vrcp.f32 %v1159_v23 }
 0xd41   :  { %2719 = vpow2.f32 %v2204_v24 }
 0xd4a   :  { %v2718_v25 = vpop.eup %2717 }
 0xd4b   :  { %v2720_v30 = vpop.eup %2719  ;;  %v1163_v35 = vmul.f32 %v2718_v25, %v3193_v52 }
 0xd4c   :  { %v1126_v33 = vadd.f32 1.0, %v2720_v30 }
 0xd4e   :  { %2721 = vrcp.f32 %v1126_v33 }
 0xd58   :  { %v2722_v22 = vpop.eup %2721 }
 0xd59   :  { %v1130_v42 = vmul.f32 %v2722_v22, %v3198_v56  ;;  %v2815_v56 = vld [vmem:[%s3475_s6] sm:$0xff]  }
 0xd9b   :  { %v1166_v26 = vpop.permute.xlu0 %1165 }
 0xd9c   :  { %v1168_v27 = vmul.f32 %v2718_v25, %v1166_v26 }
 0xd9e   :  { %1170 = vrot.lane.b32.xlu0 %v1168_v27, %s2823_s21 }
 0xdaf   :  { %v1133_v11 = vpop.permute.xlu1 %1132 }
 0xdb0   :  { %v1135_v34 = vmul.f32 %v2722_v22, %v1133_v11 }
 0xdb2   :  { %1137 = vrot.lane.b32.xlu1 %v1135_v34, %s2823_s21 }
 0xe10   :  { %v1171_v37 = vpop.permute.xlu0 %1170 }
 0xe11   :  { %v3237_v32 = vadd.f32 %v1171_v37, %v1163_v35 }
 0xe13   :  { %2723 = vtanh.f32 %v3237_v32 }
 0xe1d   :  { %v2724_v41 = vpop.eup %2723 }
 0xe1e   :  { %1176 = vrot.lane.b32.xlu0 %v2724_v41, %s2822_s16 }
 0xe24   :  { %v1138_v43 = vpop.permute.xlu1 %1137 }
 0xe25   :  { %v3242_v44 = vadd.f32 %v1138_v43, %v1130_v42  ;;  %v3322_v43 = vld [vmem:[%s3479_s5] ss:$0 sm:$0xff] }
 0xe27   :  { %2725 = vtanh.f32 %v3242_v44 }
 0xe31   :  { %v2726_v8 = vpop.eup %2725 }
 0xe32   :  { %1143 = vrot.lane.b32.xlu1 %v2726_v8, %s2822_s16 }
 0xe90   :  { %v1177_v45 = vpop.permute.xlu0 %1176 }
 0xe91   :  { %v1179_v48 = vmul.f32 %v2718_v25, %v1177_v45 }
 0xe93   :  { %v1180_v50 = vpack.c.bf16 %v1179_v48, %v1179_v48 }
 0xe95   :  { %1182 = vrot.lane.b32.xlu0 %v1180_v50, %s2823_s21 }
 0xea4   :  { %v1144_v51 = vpop.permute.xlu1 %1143 }
 0xea5   :  { %v3247_v52 = vmul.f32 %v2722_v22, %v1144_v51 }
 0xea7   :  { %v1268_v54 = vpack.c.bf16 %v3247_v52, %v3247_v52 }
 0xea9   :  { %1270 = vrot.lane.b32.xlu1 %v1268_v54, %s2823_s21 }
 0xf07   :  { %v1183_v12 = vpop.permute.xlu0 %1182 }
 0xf08   :  { %2457 = vmatmul.mubr.msk.bf16.vlgmr.msra.gmra.mrb[20].mxu0 %vm316_vm2, %v1183_v12 }
 0xf09   :  { %2461 = vmatpush3.bf16.msra.mxu0 %v3031_v5  ;;  %2464 = vmatprep.mubr.msk.bf16.mxu0 %vm2820_vm1, %v2819_v29 }
 0xf0a   :  { %2462 = vmatprep.subr.bf16.mxu0 %v2819_v29 }
 0xf0d   :  { %2463 = vmatpush3.bf16.msra.mxu0 %v3039_v10 }
 0xf0e   :  { %2468 = vmatprep.subr.bf16.mxu0 %v2819_v29 }
 0xf10   :  { %2465 = vmatmul.mubr.msk.bf16.vlgmr.msra.gmra.mrb[24].mxu0 %vm316_vm2, %v1183_v12 }
 0xf11   :  { %2469 = vmatpush3.bf16.msra.mxu0 %v3057_v36  ;;  %2472 = vmatprep.mubr.msk.bf16.mxu0 %vm2820_vm1, %v2819_v29 }
 0xf12   :  { %2470 = vmatprep.subr.bf16.mxu0 %v2819_v29 }
 0xf15   :  { %2471 = vmatpush3.bf16.msra.mxu0 %v3065_v47 }
 0xf16   :  { %2500 = vmatprep.subr.bf16.mxu0 %v2819_v29 }
 0xf1b   :  { %v1271_v55 = vpop.permute.xlu1 %1270 }
 0xf1c   :  { %2473 = vmatmul.mubr.msk.bf16.vlgmr.msra.gmra.mrb[24].mxu0 %vm316_vm2, %v1271_v55 }
 0xf1d   :  { %2501 = vmatpush3.bf16.msra.mxu0 %v2815_v56  ;;  %2504 = vmatprep.mubr.msk.bf16.mxu0 %vm2820_vm1, %v2819_v29 }
 0xf1e   :  { %2502 = vmatprep.subr.bf16.mxu0 %v2819_v29 }
 0xf21   :  { %2503 = vmatpush3.bf16.msra.mxu0 %v2945_v31 }
 0xf22   :  { %2508 = vmatprep.subr.bf16.mxu0 %v2819_v29 }
 0xfdb   :  { %v1221_v58 = vpop.f32.mrb[20].mxu0 }
 0xfdc   :  { %v1227_v59 = vadd.f32 %v1221_v58, %v279_v57  ;;  %v2458_v60 = vpop.f32.mrb[21].mxu0 }
 0xfdd   :  { %v1224_v61 = vpop.f32.mrb[22].mxu0 }
 0xfde   :  { %2727 = vtanh.f32 %v1227_v59  ;;  %v2459_v63 = vpop.f32.mrb[23].mxu0  ;;  %v2212_v7 = vmul.f32 -1.442695, %v1227_v59 }
 0xfe8   :  { %v2728_v0 = vpop.eup %2727 }
 0xfe9   :  { %1358 = vrot.lane.b32.xlu0 %v2728_v0, %s2822_s16 }
 0xfef   :  { %v1309_v1 = vpop.f32.mrb[24].mxu0 }
 0xff0   :  { %v2566_v2 = vadd.f32 %v3098_v46, %v1309_v1  ;;  %v2474_v3 = vpop.f32.mrb[25].mxu0 }
 0xff1   :  { %v1312_v4 = vpop.f32.mrb[26].mxu0 }
 0xff2   :  { %2729 = vtanh.f32 %v2566_v2  ;;  %v2475_v31 = vpop.f32.mrb[27].mxu0  ;;  %v2210_v14 = vmul.f32 -1.442695, %v2566_v2 }
 0xff3   :  { %2731 = vpow2.f32 %v2212_v7 }
 0xffc   :  { %v2730_v6 = vpop.eup %2729 }
 0xffd   :  { %1325 = vrot.lane.b32.xlu1 %v2730_v6, %s2822_s16  ;;  %v2732_v40 = vpop.eup %2731 }
 0xffe   :  { %v1352_v9 = vadd.f32 1.0, %v2732_v40 }
0x1000   :  { %2733 = vrcp.f32 %v1352_v9 }
0x1001   :  { %2735 = vpow2.f32 %v2210_v14 }
0x100a   :  { %v2734_v15 = vpop.eup %2733 }
0x100b   :  { %v2736_v17 = vpop.eup %2735  ;;  %v1356_v20 = vmul.f32 %v2734_v15, %v3237_v32 }
0x100c   :  { %v1319_v18 = vadd.f32 1.0, %v2736_v17 }
0x100e   :  { %2737 = vrcp.f32 %v1319_v18 }
0x1018   :  { %v2738_v19 = vpop.eup %2737 }
0x1019   :  { %v1323_v26 = vmul.f32 %v2738_v19, %v3242_v44  ;;  %v284_v44 = vadd.f32 %v3322_v43, %v3085_v53 }
0x105b   :  { %v1359_v28 = vpop.permute.xlu0 %1358 }
0x105c   :  { %v1361_v16 = vmul.f32 %v2734_v15, %v1359_v28 }
0x105e   :  { %1363 = vrot.lane.b32.xlu0 %v1361_v16, %s2823_s21 }
0x106f   :  { %v1326_v49 = vpop.permute.xlu1 %1325 }
0x1070   :  { %v1328_v38 = vmul.f32 %v2738_v19, %v1326_v49 }
0x1072   :  { %1330 = vrot.lane.b32.xlu1 %v1328_v38, %s2823_s21 }
0x10d0   :  { %v1364_v23 = vpop.permute.xlu0 %1363 }
0x10d1   :  { %v3283_v24 = vadd.f32 %v1364_v23, %v1356_v20 }
0x10d3   :  { %2739 = vtanh.f32 %v3283_v24 }
0x10dd   :  { %v2740_v25 = vpop.eup %2739 }
0x10de   :  { %1369 = vrot.lane.b32.xlu0 %v2740_v25, %s2822_s16 }
0x10e4   :  { %v1331_v27 = vpop.permute.xlu1 %1330 }
0x10e5   :  { %v3288_v30 = vadd.f32 %v1331_v27, %v1323_v26  ;;  %v287_v26 = vadd.f32 %v3322_v43, %v3089_v39 }
0x10e7   :  { %2741 = vtanh.f32 %v3288_v30 }
0x10f1   :  { %v2742_v33 = vpop.eup %2741 }
0x10f2   :  { %1336 = vrot.lane.b32.xlu1 %v2742_v33, %s2822_s16 }
0x1150   :  { %v1370_v22 = vpop.permute.xlu0 %1369 }
0x1151   :  { %v1372_v11 = vmul.f32 %v2734_v15, %v1370_v22 }
0x1153   :  { %v1373_v34 = vpack.c.bf16 %v1372_v11, %v1372_v11 }
0x1155   :  { %1375 = vrot.lane.b32.xlu0 %v1373_v34, %s2823_s21 }
0x1164   :  { %v1337_v35 = vpop.permute.xlu1 %1336 }
0x1165   :  { %v3293_v37 = vmul.f32 %v2738_v19, %v1337_v35 }
0x1167   :  { %v1461_v32 = vpack.c.bf16 %v3293_v37, %v3293_v37 }
0x1169   :  { %1463 = vrot.lane.b32.xlu1 %v1461_v32, %s2823_s21 }
0x11c7   :  { %v1376_v41 = vpop.permute.xlu0 %1375 }
0x11c8   :  { %2481 = vmatmul.mubr.msk.bf16.vlgmr.msra.gmra.mrb[24].mxu1 %vm316_vm2, %v1376_v41 }
0x11c9   :  { %2485 = vmatpush3.bf16.msra.mxu1 %v3031_v5  ;;  %2488 = vmatprep.mubr.msk.bf16.mxu1 %vm2820_vm1, %v2819_v29 }
0x11ca   :  { %2486 = vmatprep.subr.bf16.mxu1 %v2819_v29 }
0x11cd   :  { %2487 = vmatpush3.bf16.msra.mxu1 %v3039_v10 }
0x11ce   :  { %2492 = vmatprep.subr.bf16.mxu1 %v2819_v29 }
0x11d0   :  { %2489 = vmatmul.mubr.msk.bf16.vlgmr.msra.gmra.mrb[28].mxu1 %vm316_vm2, %v1376_v41 }
0x11d1   :  { %2493 = vmatpush3.bf16.msra.mxu1 %v3057_v36  ;;  %2496 = vmatprep.mubr.msk.bf16.mxu1 %vm2820_vm1, %v2819_v29 }
0x11d2   :  { %2494 = vmatprep.subr.bf16.mxu1 %v2819_v29 }
0x11d5   :  { %2495 = vmatpush3.bf16.msra.mxu1 %v3065_v47 }
0x11d6   :  { %2524 = vmatprep.subr.bf16.mxu1 %v2819_v29 }
0x11db   :  { %v1464_v42 = vpop.permute.xlu1 %1463 }
0x11dc   :  { %2497 = vmatmul.mubr.msk.bf16.vlgmr.msra.gmra.mrb[28].mxu1 %vm316_vm2, %v1464_v42 }
0x11dd   :  { %2525 = vmatpush3.bf16.msra.mxu1 %v3031_v5  ;;  %2528 = vmatprep.mubr.msk.bf16.mxu1 %vm2820_vm1, %v2819_v29 }
0x11de   :  { %2526 = vmatprep.subr.bf16.mxu1 %v2819_v29 }
0x11e1   :  { %2527 = vmatpush3.bf16.msra.mxu1 %v3039_v10 }
0x11e2   :  { %2532 = vmatprep.subr.bf16.mxu1 %v2819_v29 }
0x129b   :  { %v1414_v8 = vpop.f32.mrb[24].mxu1 }
0x129c   :  { %v1420_v45 = vadd.f32 %v1414_v8, %v284_v44  ;;  %v2482_v48 = vpop.f32.mrb[25].mxu1 }
0x129d   :  { %v1417_v50 = vpop.f32.mrb[26].mxu1 }
0x129e   :  { %2743 = vtanh.f32 %v1420_v45  ;;  %v2483_v51 = vpop.f32.mrb[27].mxu1  ;;  %v2218_v53 = vmul.f32 -1.442695, %v1420_v45 }
0x12a8   :  { %v2744_v54 = vpop.eup %2743 }
0x12a9   :  { %1551 = vrot.lane.b32.xlu0 %v2744_v54, %s2822_s16 }
0x12af   :  { %v1502_v12 = vpop.f32.mrb[28].mxu1 }
0x12b0   :  { %v2567_v55 = vadd.f32 %v3098_v46, %v1502_v12  ;;  %v2498_v56 = vpop.f32.mrb[29].mxu1 }
0x12b1   :  { %v1505_v57 = vpop.f32.mrb[30].mxu1 }
0x12b2   :  { %2745 = vtanh.f32 %v2567_v55  ;;  %v2499_v58 = vpop.f32.mrb[31].mxu1  ;;  %v2216_v63 = vmul.f32 -1.442695, %v2567_v55 }
0x12b3   :  { %2747 = vpow2.f32 %v2218_v53 }
0x12bc   :  { %v2746_v59 = vpop.eup %2745 }
0x12bd   :  { %1518 = vrot.lane.b32.xlu1 %v2746_v59, %s2822_s16  ;;  %v2748_v60 = vpop.eup %2747 }
0x12be   :  { %v1545_v61 = vadd.f32 1.0, %v2748_v60 }
0x12c0   :  { %2749 = vrcp.f32 %v1545_v61 }
0x12c1   :  { %2751 = vpow2.f32 %v2216_v63 }
0x12ca   :  { %v2750_v0 = vpop.eup %2749 }
0x12cb   :  { %v2752_v3 = vpop.eup %2751  ;;  %v1549_v40 = vmul.f32 %v2750_v0, %v3283_v24 }
0x12cc   :  { %v1512_v4 = vadd.f32 1.0, %v2752_v3 }
0x12ce   :  { %2753 = vrcp.f32 %v1512_v4 }
0x12d8   :  { %v2754_v31 = vpop.eup %2753 }
0x12d9   :  { %v1516_v28 = vmul.f32 %v2754_v31, %v3288_v30 }
0x131b   :  { %v1552_v1 = vpop.permute.xlu0 %1551 }
0x131c   :  { %v1554_v2 = vmul.f32 %v2750_v0, %v1552_v1 }
0x131e   :  { %1556 = vrot.lane.b32.xlu0 %v1554_v2, %s2823_s21 }
0x132f   :  { %v1519_v6 = vpop.permute.xlu1 %1518 }
0x1330   :  { %v1521_v7 = vmul.f32 %v2754_v31, %v1519_v6 }
0x1332   :  { %1523 = vrot.lane.b32.xlu1 %v1521_v7, %s2823_s21  ;;  %v2817_v7 = vld [vmem:[%s3481_s9] sm:$0xff]  }
0x1390   :  { %v1557_v9 = vpop.permute.xlu0 %1556 }
0x1391   :  { %v3332_v14 = vadd.f32 %v1557_v9, %v1549_v40  ;;  %v2818_v40 = vld [vmem:[%s3481_s9 + $0x8] sm:$0xff]  }
0x1393   :  { %2755 = vtanh.f32 %v3332_v14 }
0x139d   :  { %v2756_v15 = vpop.eup %2755 }
0x139e   :  { %1562 = vrot.lane.b32.xlu0 %v2756_v15, %s2822_s16 }
0x13a4   :  { %v1524_v16 = vpop.permute.xlu1 %1523 }
0x13a5   :  { %v3337_v17 = vadd.f32 %v1524_v16, %v1516_v28 }
0x13a7   :  { %2757 = vtanh.f32 %v3337_v17 }
0x13b1   :  { %v2758_v18 = vpop.eup %2757 }
0x13b2   :  { %1529 = vrot.lane.b32.xlu1 %v2758_v18, %s2822_s16  ;;  %v303_v18 = vld [vmem:[%s3483_s1] sm:$0xff] }
0x13b3   :  { %vm568_vm3 = vcmp.gt.f32.partialorder %v303_v18, 0.0  ;;  %vm761_vm4 = vcmp.gt.f32.partialorder %v303_v18, 1.0  ;;  %vm1726_vm5 = vcmp.gt.f32.partialorder %v303_v18, 6.0  ;;  %vm1878_vm6 = vcmp.gt.f32.partialorder %v303_v18, 7.0 }
0x13b4   :  { %vm954_vm7 = vcmp.gt.f32.partialorder %v303_v18, 2.0  ;;  %vm1147_vm8 = vcmp.gt.f32.partialorder %v303_v18, 3.0  ;;  %vm1340_vm9 = vcmp.gt.f32.partialorder %v303_v18, 4.0  ;;  %vm1533_vm10 = vcmp.gt.f32.partialorder %v303_v18, 5.0 }
0x1410   :  { %v1563_v19 = vpop.permute.xlu0 %1562 }
0x1411   :  { %v1565_v49 = vmul.f32 %v2750_v0, %v1563_v19  ;;  %v2187_v19 = vsel %vm568_vm3, 1.0, %v2819_v29 }
0x1413   :  { %v1566_v38 = vpack.c.bf16 %v1565_v49, %v1565_v49  ;;  %v2193_v49 = vsel %vm761_vm4, 1.0, %v2819_v29 }
0x1415   :  { %1568 = vrot.lane.b32.xlu0 %v1566_v38, %s2823_s21 }
0x1424   :  { %v1530_v20 = vpop.permute.xlu1 %1529 }
0x1425   :  { %v3342_v23 = vmul.f32 %v2754_v31, %v1530_v20  ;;  %v2223_v20 = vsel %vm1726_vm5, 1.0, %v2819_v29 }
0x1427   :  { %v1654_v24 = vpack.c.bf16 %v3342_v23, %v3342_v23 }
0x1429   :  { %1656 = vrot.lane.b32.xlu1 %v1654_v24, %s2823_s21  ;;  %v2228_v24 = vsel %vm1878_vm6, 1.0, %v2819_v29 }
0x1487   :  { %v1569_v25 = vpop.permute.xlu0 %1568 }
0x1488   :  { %2505 = vmatmul.mubr.msk.bf16.vlgmr.msra.gmra.mrb[28].mxu0 %vm316_vm2, %v1569_v25 }
0x1489   :  { %2509 = vmatpush3.bf16.msra.mxu0 %v3031_v5  ;;  %2512 = vmatprep.mubr.msk.bf16.mxu0 %vm2820_vm1, %v2819_v29 }
0x148a   :  { %2510 = vmatprep.subr.bf16.mxu0 %v2819_v29 }
0x148d   :  { %2511 = vmatpush3.bf16.msra.mxu0 %v3039_v10 }
0x148e   :  { %2516 = vmatprep.subr.bf16.mxu0 %v2819_v29 }
0x1490   :  { %2513 = vmatmul.mubr.msk.bf16.vlgmr.msra.gmra.mrb[32].mxu0 %vm316_vm2, %v1569_v25  ;;  %v2624_v25 = vpack.i.bf16 %v2228_v24, %v2223_v20 }
0x1491   :  { %2517 = vmatpush3.bf16.msra.mxu0 %v3057_v36  ;;  %2520 = vmatprep.mubr.msk.bf16.mxu0 %vm2820_vm1, %v2819_v29 }
0x1492   :  { %2518 = vmatprep.subr.bf16.mxu0 %v2819_v29 }
0x1495   :  { %2519 = vmatpush3.bf16.msra.mxu0 %v3065_v47 }
0x149b   :  { %v1657_v5 = vpop.permute.xlu1 %1656 }
0x149c   :  { %2521 = vmatmul.mubr.msk.bf16.vlgmr.msra.gmra.mrb[32].mxu0 %vm316_vm2, %v1657_v5 }
0x155b   :  { %v1607_v10 = vpop.f32.mrb[28].mxu0 }
0x155c   :  { %v1613_v27 = vadd.f32 %v1607_v10, %v287_v26  ;;  %v2506_v30 = vpop.f32.mrb[29].mxu0 }
0x155d   :  { %v1610_v33 = vpop.f32.mrb[30].mxu0 }
0x155e   :  { %2759 = vtanh.f32 %v1613_v27  ;;  %v2507_v22 = vpop.f32.mrb[31].mxu0  ;;  %v2224_v39 = vmul.f32 -1.442695, %v1613_v27  ;;  %v2199_v33 = vsel %vm954_vm7, 1.0, %v2819_v29 }
0x155f   :  { %v2205_v22 = vsel %vm1147_vm8, 1.0, %v2819_v29 }
0x1568   :  { %v2760_v36 = vpop.eup %2759 }
0x1569   :  { %1744 = vrot.lane.b32.xlu0 %v2760_v36, %s2822_s16 }
0x156f   :  { %v1695_v11 = vpop.f32.mrb[32].mxu0 }
0x1570   :  { %v2568_v34 = vadd.f32 %v3098_v46, %v1695_v11  ;;  %v2522_v35 = vpop.f32.mrb[33].mxu0  ;;  %v2614_v11 = vpack.i.bf16 %v2205_v22, %v2199_v33 }
0x1571   :  { %v1698_v47 = vpop.f32.mrb[34].mxu0  ;;  %v2217_v35 = vsel %vm1533_vm10, 1.0, %v2819_v29 }
0x1572   :  { %2761 = vtanh.f32 %v2568_v34  ;;  %v2523_v32 = vpop.f32.mrb[35].mxu0  ;;  %v2222_v44 = vmul.f32 -1.442695, %v2568_v34  ;;  %v2211_v34 = vsel %vm1340_vm9, 1.0, %v2819_v29 }
0x1573   :  { %2763 = vpow2.f32 %v2224_v39  ;;  %v2619_v47 = vpack.i.bf16 %v2217_v35, %v2211_v34 }
0x157c   :  { %v2762_v41 = vpop.eup %2761 }
0x157d   :  { %1711 = vrot.lane.b32.xlu1 %v2762_v41, %s2822_s16  ;;  %v2764_v42 = vpop.eup %2763 }
0x157e   :  { %v1738_v43 = vadd.f32 1.0, %v2764_v42 }
0x1580   :  { %2765 = vrcp.f32 %v1738_v43 }
0x1581   :  { %2767 = vpow2.f32 %v2222_v44 }
0x158a   :  { %v2766_v8 = vpop.eup %2765 }
0x158b   :  { %v2768_v50 = vpop.eup %2767  ;;  %v1742_v56 = vmul.f32 %v2766_v8, %v3332_v14 }
0x158c   :  { %v1705_v51 = vadd.f32 1.0, %v2768_v50  ;;  %v2637_v50 = vld [vmem:[%s3484_s10 + $0x8] sm:$0xff]  }
0x158e   :  { %2769 = vrcp.f32 %v1705_v51 }
0x1598   :  { %v2770_v54 = vpop.eup %2769 }
0x1599   :  { %v1709_v53 = vmul.f32 %v2770_v54, %v3337_v17 }
0x15db   :  { %v1745_v45 = vpop.permute.xlu0 %1744 }
0x15dc   :  { %v1747_v48 = vmul.f32 %v2766_v8, %v1745_v45 }
0x15de   :  { %1749 = vrot.lane.b32.xlu0 %v1747_v48, %s2823_s21 }
0x15ef   :  { %v1712_v12 = vpop.permute.xlu1 %1711 }
0x15f0   :  { %v1714_v55 = vmul.f32 %v2770_v54, %v1712_v12 }
0x15f2   :  { %1716 = vrot.lane.b32.xlu1 %v1714_v55, %s2823_s21 }
0x1650   :  { %v1750_v57 = vpop.permute.xlu0 %1749 }
0x1651   :  { %v1752_v58 = vadd.f32 %v1750_v57, %v1742_v56 }
0x1653   :  { %2771 = vtanh.f32 %v1752_v58 }
0x165d   :  { %v2772_v59 = vpop.eup %2771 }
0x165e   :  { %1755 = vrot.lane.b32.xlu0 %v2772_v59, %s2822_s16 }
0x1664   :  { %v1717_v60 = vpop.permute.xlu1 %1716 }
0x1665   :  { %v3371_v61 = vadd.f32 %v1717_v60, %v1709_v53 }
0x1667   :  { %2773 = vtanh.f32 %v3371_v61 }
0x1671   :  { %v2774_v63 = vpop.eup %2773 }
0x1672   :  { %1722 = vrot.lane.b32.xlu1 %v2774_v63, %s2822_s16 }
0x16d0   :  { %v1756_v0 = vpop.permute.xlu0 %1755 }
0x16d1   :  { %v1758_v1 = vmul.f32 %v2766_v8, %v1756_v0 }
0x16d3   :  { %v1759_v2 = vpack.c.bf16 %v1758_v1, %v1758_v1 }
0x16d5   :  { %1761 = vrot.lane.b32.xlu0 %v1759_v2, %s2823_s21 }
0x16e4   :  { %v1723_v3 = vpop.permute.xlu1 %1722 }
0x16e5   :  { %v3376_v4 = vmul.f32 %v2770_v54, %v1723_v3 }
0x16e7   :  { %v1806_v31 = vpack.c.bf16 %v3376_v4, %v3376_v4 }
0x16e9   :  { %1808 = vrot.lane.b32.xlu1 %v1806_v31, %s2823_s21 }
0x1747   :  { %v1762_v6 = vpop.permute.xlu0 %1761 }
0x1748   :  { %2529 = vmatmul.mubr.msk.bf16.vlgmr.msra.gmra.mrb[32].mxu1 %vm316_vm2, %v1762_v6 }
0x1749   :  { %2533 = vmatpush3.bf16.msra.mxu1 %v2817_v7  ;;  %2536 = vmatprep.mubr.msk.bf16.mxu1 %vm2820_vm1, %v2819_v29 }
0x174a   :  { %2534 = vmatprep.subr.bf16.mxu1 %v2819_v29  ;;  %v2636_v29 = vld [vmem:[%s3484_s10] sm:$0xff]  }
0x174b   :  { %2540 = vmatprep.subr.bf16.mxu0 %v2636_v29 }
0x174c   :  { %2541 = vmatpush3.bf16.msra.mxu0 %v2636_v29 }
0x174d   :  { %2535 = vmatpush3.bf16.msra.mxu1 %v2818_v40  ;;  %2542 = vmatprep.subr.bf16.mxu0 %v2637_v50 }
0x1750   :  { %2543 = vmatpush3.bf16.msra.mxu0 %v2637_v50 }
0x175b   :  { %v1809_v9 = vpop.permute.xlu1 %1808 }
0x175c   :  { %2537 = vmatmul.mubr.msk.bf16.vlgmr.msra.gmra.mrb[32].mxu1 %vm316_vm2, %v1809_v9  ;;  %v2229_v9 = vld [vmem:[%s3487_s11] ss:$0 sm:$0xff] }
0x182f   :  { %v1847_v14 = vpop.f32.mrb[32].mxu1 }
0x1830   :  { %v2569_v15 = vadd.f32 %v3098_v46, %v1847_v14  ;;  %v2538_v28 = vpop.f32.mrb[33].mxu1  ;;  %v2608_v46 = vpack.i.bf16 %v2193_v49, %v2187_v19 }
0x1831   :  { %v1850_v16 = vpop.f32.mrb[34].mxu1 }
0x1832   :  { %2775 = vtanh.f32 %v2569_v15  ;;  %v2539_v17 = vpop.f32.mrb[35].mxu1  ;;  %v2227_v5 = vmul.f32 -1.442695, %v2569_v15 }
0x1834   :  { %2777 = vpow2.f32 %v2227_v5 }
0x183c   :  { %v2776_v38 = vpop.eup %2775 }
0x183d   :  { %1863 = vrot.lane.b32.xlu0 %v2776_v38, %s2822_s16 }
0x183e   :  { %v2778_v26 = vpop.eup %2777 }
0x183f   :  { %v1857_v10 = vadd.f32 1.0, %v2778_v26 }
0x1841   :  { %2609 = vperm.xlu0 %2607, %v2608_v46   ;;  %2779 = vrcp.f32 %v1857_v10 }
0x1845   :  { %2625 = vperm.xlu0 %2607, %v2624_v25  }
0x184b   :  { %v2780_v27 = vpop.eup %2779 }
0x184c   :  { %v1861_v8 = vmul.f32 %v2780_v27, %v3371_v61 }
0x18af   :  { %v1864_v30 = vpop.permute.xlu0 %1863 }
0x18b0   :  { %v1866_v36 = vmul.f32 %v2780_v27, %v1864_v30 }
0x18b2   :  { %1868 = vrot.lane.b32.xlu1 %v1866_v36, %s2823_s21 }
0x18b6   :  { %2615 = vperm.xlu1 %2613, %v2614_v11  }
0x18ba   :  { %2620 = vperm.xlu1 %2613, %v2619_v47  }
0x18c0   :  { %v2610_v32 = vpop.permute.xlu0 %2609 }
0x18c1   :  { %v2612_v41 = vunpack.i.h.bf16 %v2610_v32  ;;  %v2611_v39 = vunpack.i.l.bf16 %v2610_v32 }
0x18c3   :  { %v769_v42 = vmul.f32 %v2612_v41, %v3159_v13  ;;  %v576_v43 = vmul.f32 %v2611_v39, %v3115_v21 }
0x18c4   :  { %v2626_v13 = vpop.permute.xlu0 %2625 }
0x18c5   :  { %v1887_v44 = vpack.c.bf16 %v769_v42, %v576_v43  ;;  %v2627_v1 = vunpack.i.l.bf16 %v2626_v13  ;;  %v2628_v2 = vunpack.i.h.bf16 %v2626_v13 }
0x18c7   :  { %1906 = vrot.lane.b32.xlu0 %v1887_v44, %s2823_s21  ;;  %v1734_v3 = vmul.f32 %v2627_v1, %v3376_v4  ;;  %v19_v4 = vstv %s3486_s13 }
0x18c8   :  { %20 = vst [vmem:[#allocation2] sm:$0x1] %v19_v4 }
0x18cf   :  { %v2236_v42 = vld [vmem:[#allocation2] ss:$0 sm:$0xff] }
0x1924   :  { %v1869_v45 = vpop.permute.xlu1 %1868 }
0x1925   :  { %v1871_v48 = vadd.f32 %v1869_v45, %v1861_v8 }
0x1927   :  { %2781 = vtanh.f32 %v1871_v48 }
0x1931   :  { %v2782_v21 = vpop.eup %2781 }
0x1932   :  { %1874 = vrot.lane.b32.xlu1 %v2782_v21, %s2822_s16 }
0x1935   :  { %v2616_v51 = vpop.permute.xlu1 %2615 }
0x1936   :  { %v2618_v54 = vunpack.i.h.bf16 %v2616_v51  ;;  %v2617_v12 = vunpack.i.l.bf16 %v2616_v51 }
0x1938   :  { %v1155_v55 = vmul.f32 %v2618_v54, %v3247_v52  ;;  %v962_v56 = vmul.f32 %v2617_v12, %v3203_v62 }
0x1939   :  { %v1907_v57 = vpop.permute.xlu0 %1906  ;;  %v2621_v58 = vpop.permute.xlu1 %2620 }
0x193a   :  { %v2623_v59 = vunpack.i.h.bf16 %v2621_v58  ;;  %v2622_v53 = vunpack.i.l.bf16 %v2621_v58  ;;  %2544 = vmatprep.mubr.msk.bf16.mxu0 %vm316_vm2, %v1907_v57  ;;  %v1888_v60 = vpack.c.bf16 %v1155_v55, %v962_v56 }
0x193c   :  { %v1541_v61 = vmul.f32 %v2623_v59, %v3342_v23  ;;  %v1348_v63 = vmul.f32 %v2622_v53, %v3293_v37  ;;  %1908 = vrot.lane.b32.xlu1 %v1888_v60, %s2823_s21  ;;  %v2638_v37 = vld [vmem:[%s3485_s12] sm:$0xff]  }
0x193d   :  { %2552 = vmatprep.subr.bf16.mxu1 %v2638_v37 }
0x193e   :  { %v1889_v0 = vpack.c.bf16 %v1541_v61, %v1348_v63  ;;  %2553 = vmatpush3.bf16.msra.mxu1 %v2638_v37 }
0x1940   :  { %1910 = vrot.lane.b32.xlu0 %v1889_v0, %s2823_s21 }
0x19a4   :  { %v1875_v52 = vpop.permute.xlu1 %1874 }
0x19a5   :  { %v1877_v62 = vmul.f32 %v2780_v27, %v1875_v52 }
0x19a7   :  { %v1886_v31 = vmul.f32 %v2628_v2, %v1877_v62 }
0x19a9   :  { %v1890_v6 = vpack.c.bf16 %v1886_v31, %v1734_v3 }
0x19ab   :  { %1912 = vrot.lane.b32.xlu1 %v1890_v6, %s2823_s21 }
0x19ae   :  { %v1909_v7 = vpop.permute.xlu1 %1908 }
0x19af   :  { %2545 = vmatmul.mubr.msk.bf16.vlgmr.msra.gmra.mrb[36].mxu0 %vm316_vm2, %v1909_v7 }
0x19b2   :  { %v1911_v23 = vpop.permute.xlu0 %1910 }
0x19b3   :  { %2548 = vmatprep.mubr.msk.bf16.mxu0 %vm316_vm2, %v1911_v23 }
0x1a1d   :  { %v1913_v40 = vpop.permute.xlu1 %1912 }
0x1a1e   :  { %2549 = vmatmul.mubr.msk.bf16.gmra.mrb[40].mxu0 %vm316_vm2, %v1913_v40 }
0x1a82   :  { %v2546_v14 = vpop.f32.mrb[36].mxu0 }
0x1a83   :  { %v1981_v15 = vadd.f32 %v2546_v14, %v2229_v9  ;;  %v1972_v28 = vpop.f32.mrb[37].mxu0 }
0x1a84   :  { %v1973_v16 = vadd.f32 %v2229_v9, %v1972_v28  ;;  %v2547_v17 = vpop.f32.mrb[38].mxu0 }
0x1a85   :  { %v1984_v18 = vadd.f32 %v2547_v17, %v2229_v9  ;;  %v1975_v19 = vpop.f32.mrb[39].mxu0  ;;  %v2005_v38 = vmax.f32 %v1981_v15, 0.0 }
0x1a86   :  { %v1976_v49 = vadd.f32 %v2229_v9, %v1975_v19  ;;  %v2003_v20 = vmax.f32 %v1973_v16, 0.0 }
0x1a87   :  { %v2006_v46 = vmax.f32 %v1984_v18, 0.0 }
0x1a88   :  { %v2004_v24 = vmax.f32 %v1976_v49, 0.0 }
0x1a89   :  { %v2012_v25 = vpack.c.bf16 %v2006_v46, %v2005_v38 }
0x1a8a   :  { %v2011_v5 = vpack.c.bf16 %v2004_v24, %v2003_v20 }
0x1a8c   :  { %2554 = vmatprep.mubr.msk.bf16.mxu1 %vm58_vm0, %v2011_v5 }
0x1a8d   :  { %2555 = vmatmul.mubr.msk.bf16.vlgmr.msra.gmra.mrb[36].mxu1 %vm58_vm0, %v2012_v25 }
0x1af1   :  { %v2550_v26 = vpop.f32.mrb[40].mxu0 }
0x1af2   :  { %v1997_v10 = vadd.f32 %v2550_v26, %v2229_v9  ;;  %v1988_v27 = vpop.f32.mrb[41].mxu0 }
0x1af3   :  { %v1989_v30 = vadd.f32 %v2229_v9, %v1988_v27  ;;  %v2551_v33 = vpop.f32.mrb[42].mxu0 }
0x1af4   :  { %v2000_v22 = vadd.f32 %v2551_v33, %v2229_v9  ;;  %v1991_v36 = vpop.f32.mrb[43].mxu0  ;;  %v2009_v34 = vmax.f32 %v1997_v10, 0.0 }
0x1af5   :  { %v1992_v11 = vadd.f32 %v2229_v9, %v1991_v36  ;;  %v2007_v47 = vmax.f32 %v1989_v30, 0.0 }
0x1af6   :  { %v2010_v35 = vmax.f32 %v2000_v22, 0.0 }
0x1af7   :  { %v2008_v32 = vmax.f32 %v1992_v11, 0.0 }
0x1af8   :  { %v2014_v41 = vpack.c.bf16 %v2010_v35, %v2009_v34 }
0x1af9   :  { %v2013_v39 = vpack.c.bf16 %v2008_v32, %v2007_v47 }
0x1afb   :  { %2558 = vmatprep.mubr.msk.bf16.mxu1 %vm58_vm0, %v2013_v39 }
0x1afc   :  { %2559 = vmatmul.mubr.msk.bf16.gmra.mrb[40].mxu1 %vm58_vm0, %v2014_v41 }
0x1b60   :  { %v2556_v43 = vpop.f32.mrb[36].mxu1 }
0x1b61   :  { %v2085_v44 = vadd.f32 %v2556_v43, %v2236_v42  ;;  %v2076_v8 = vpop.f32.mrb[37].mxu1 }
0x1b62   :  { %v2077_v45 = vadd.f32 %v2236_v42, %v2076_v8  ;;  %v2557_v48 = vpop.f32.mrb[38].mxu1 }
0x1b63   :  { %v2244_v29 = vmul.f32 -1.442695, %v2085_v44  ;;  %v2088_v50 = vadd.f32 %v2557_v48, %v2236_v42  ;;  %v2079_v21 = vpop.f32.mrb[39].mxu1 }
0x1b64   :  { %v2242_v13 = vmul.f32 -1.442695, %v2077_v45  ;;  %v2080_v51 = vadd.f32 %v2236_v42, %v2079_v21 }
0x1b65   :  { %2783 = vpow2.f32 %v2244_v29  ;;  %v2245_v54 = vmul.f32 -1.442695, %v2088_v50 }
0x1b66   :  { %2785 = vpow2.f32 %v2242_v13  ;;  %v2243_v12 = vmul.f32 -1.442695, %v2080_v51 }
0x1b67   :  { %2787 = vpow2.f32 %v2245_v54 }
0x1b68   :  { %2789 = vpow2.f32 %v2243_v12 }
0x1b6f   :  { %v2784_v55 = vpop.eup %2783 }
0x1b70   :  { %v2786_v56 = vpop.eup %2785  ;;  %v2133_v57 = vadd.f32 1.0, %v2784_v55 }
0x1b71   :  { %v2788_v58 = vpop.eup %2787  ;;  %v2131_v59 = vadd.f32 1.0, %v2786_v56 }
0x1b72   :  { %v2790_v53 = vpop.eup %2789  ;;  %2791 = vrcp.f32 %v2133_v57  ;;  %v2134_v60 = vadd.f32 1.0, %v2788_v58 }
0x1b73   :  { %2793 = vrcp.f32 %v2131_v59  ;;  %v2132_v61 = vadd.f32 1.0, %v2790_v53 }
0x1b74   :  { %2795 = vrcp.f32 %v2134_v60 }
0x1b75   :  { %2797 = vrcp.f32 %v2132_v61 }
0x1b7c   :  { %v2792_v63 = vpop.eup %2791 }
0x1b7d   :  { %v2794_v0 = vpop.eup %2793  ;;  %2158 = vst.msk [vmem:[%s3488_s14 + $0x10] sm:$0xff] %vm2155_vm11, %v2792_v63 }
0x1b7e   :  { %v2796_v1 = vpop.eup %2795  ;;  %2156 = vst.msk [vmem:[%s3488_s14] sm:$0xff] %vm2155_vm11, %v2794_v0 }
0x1b7f   :  { %v2798_v52 = vpop.eup %2797  ;;  %2159 = vst.msk [vmem:[%s3488_s14 + $0x18] sm:$0xff] %vm2155_vm11, %v2796_v1 }
0x1b80   :  { %2157 = vst.msk [vmem:[%s3488_s14 + $0x8] sm:$0xff] %vm2155_vm11, %v2798_v52 }
0x1bcf   :  { %v2560_v2 = vpop.f32.mrb[40].mxu1 }
0x1bd0   :  { %v2101_v62 = vadd.f32 %v2560_v2, %v2236_v42  ;;  %v2092_v3 = vpop.f32.mrb[41].mxu1 }
0x1bd1   :  { %v2093_v31 = vadd.f32 %v2236_v42, %v2092_v3  ;;  %v2561_v6 = vpop.f32.mrb[42].mxu1 }
0x1bd2   :  { %v2248_v7 = vmul.f32 -1.442695, %v2101_v62  ;;  %v2104_v23 = vadd.f32 %v2561_v6, %v2236_v42  ;;  %v2095_v37 = vpop.f32.mrb[43].mxu1 }
0x1bd3   :  { %v2246_v40 = vmul.f32 -1.442695, %v2093_v31  ;;  %v2096_v4 = vadd.f32 %v2236_v42, %v2095_v37 }
0x1bd4   :  { %2799 = vpow2.f32 %v2248_v7  ;;  %v2249_v9 = vmul.f32 -1.442695, %v2104_v23 }
0x1bd5   :  { %2801 = vpow2.f32 %v2246_v40  ;;  %v2247_v14 = vmul.f32 -1.442695, %v2096_v4 }
0x1bd6   :  { %2803 = vpow2.f32 %v2249_v9 }
0x1bd7   :  { %2805 = vpow2.f32 %v2247_v14 }
0x1bde   :  { %v2800_v15 = vpop.eup %2799 }
0x1bdf   :  { %v2802_v28 = vpop.eup %2801  ;;  %v2137_v16 = vadd.f32 1.0, %v2800_v15 }
0x1be0   :  { %v2804_v17 = vpop.eup %2803  ;;  %v2135_v18 = vadd.f32 1.0, %v2802_v28 }
0x1be1   :  { %v2806_v19 = vpop.eup %2805  ;;  %2807 = vrcp.f32 %v2137_v16  ;;  %v2138_v49 = vadd.f32 1.0, %v2804_v17 }
0x1be2   :  { %2809 = vrcp.f32 %v2135_v18  ;;  %v2136_v38 = vadd.f32 1.0, %v2806_v19 }
0x1be3   :  { %2811 = vrcp.f32 %v2138_v49 }
0x1be4   :  { %2813 = vrcp.f32 %v2136_v38 }
0x1beb   :  { %v2808_v46 = vpop.eup %2807 }
0x1bec   :  { %v2810_v20 = vpop.eup %2809  ;;  %2162 = vst.msk [vmem:[%s3488_s14 + $0x30] sm:$0xff] %vm2155_vm11, %v2808_v46 }
0x1bed   :  { %v2812_v24 = vpop.eup %2811  ;;  %2160 = vst.msk [vmem:[%s3488_s14 + $0x20] sm:$0xff] %vm2155_vm11, %v2810_v20 }
0x1bee   :  { %v2814_v25 = vpop.eup %2813  ;;  %2163 = vst.msk [vmem:[%s3488_s14 + $0x38] sm:$0xff] %vm2155_vm11, %v2812_v24 }
0x1bef   :  { %2161 = vst.msk [vmem:[%s3488_s14 + $0x28] sm:$0xff] %vm2155_vm11, %v2814_v25 }

</bundles_post_ra>
